<compile_context>
chip_gen: v7x
topology: tpu7x:2x2x1
jax: 0.10.0
libtpu: 0.0.40
codegen_flags: <defaults>
</compile_context>

<pallas_src>
import numpy as np
import jax
import jax.numpy as jnp
from jax import lax
from jax.experimental import pallas as pl
from jax.experimental.pallas import tpu as pltpu

VOLUME_CONTROL_SIGNAL_COUNT = 4
BANDPASS_CONTROL_SIGNAL_COUNT = 12
N_OUT = VOLUME_CONTROL_SIGNAL_COUNT + BANDPASS_CONTROL_SIGNAL_COUNT

C1, C2, C3 = 16, 32, 64          # conv channel widths (fixed by the module)
D_FC = 128                       # fc hidden width
N_PAD = 128                      # fc2 output padded to a lane-dense 128 columns
F32 = jnp.float32


# ----------------------------- in-kernel helpers -----------------------------

def _conv3x3_relu(y, mask_up, mask_dn, w_ref, bias_row, fuse_k):
    """3x3 conv (padding=1) + ReLU on a lane-dense slab y: (N, W*cin), lanes
    (w-major, c-minor).  Vertical taps come from sublane rolls + per-sample
    border masks; horizontal taps + zero padding live in the banded
    block-Toeplitz weight matrices stacked along K in w_ref: (3*W*cin, W*cout)."""
    n, k = y.shape
    y_up = pltpu.roll(y, 1, axis=0) * mask_up          # row above (0 at sample top)
    y_dn = pltpu.roll(y, n - 1, axis=0) * mask_dn      # row below (0 at sample bottom)
    if fuse_k:
        # K pieces are 128-lane aligned -> one fused MXU matmul (K = 3*W*cin).
        out = jnp.dot(jnp.concatenate([y_up, y, y_dn], axis=1), w_ref[...],
                      preferred_element_type=F32)
    else:
        out = (jnp.dot(y_up, w_ref[0:k, :], preferred_element_type=F32)
               + jnp.dot(y,    w_ref[k:2 * k, :], preferred_element_type=F32)
               + jnp.dot(y_dn, w_ref[2 * k:3 * k, :], preferred_element_type=F32))
    return jnp.maximum(out + bias_row, 0.0)


def _maxpool2x2(y, c, s_row_ref, t_lane_ref):
    """2x2 max pool.  Rows: pairwise max via sublane roll, then ONE even-row
    selection matmul.  Lanes (w-major, c-minor): pairwise max via lane roll by
    c, then ONE even-w selection matmul."""
    n, l = y.shape
    y = jnp.maximum(y, pltpu.roll(y, n - 1, axis=0))                   # max(y[i], y[i+1])
    y = jnp.dot(s_row_ref[...], y, preferred_element_type=F32)         # keep even rows
    y = jnp.maximum(y, pltpu.roll(y, l - c, axis=1))                   # max over w, w+1
    return jnp.dot(y, t_lane_ref[...], preferred_element_type=F32)     # keep even w


# --------------------------------- the kernel --------------------------------

def _fused_kernel(x_ref,
                  w1_ref, b1_ref, mu1_ref, md1_ref, sr1_ref, tl1_ref,
                  w2_ref, b2_ref, mu2_ref, md2_ref, sr2_ref, tl2_ref,
                  w3_ref, b3_ref, mu3_ref, md3_ref,
                  rsum_ref, gap_ref,
                  fc1w_ref, fc1b_ref, fc2w_ref, fc2b_ref,
                  o_ref):
    y = x_ref[...]                                                     # (BT*H, W*2)

    # conv1 + ReLU + maxpool(2,2)
    y = _conv3x3_relu(y, mu1_ref[...], md1_ref[...], w1_ref, b1_ref[...], fuse_k=False)
    y = _maxpool2x2(y, C1, sr1_ref, tl1_ref)                           # (BT*H/2, (W/2)*C1)

    # conv2 + ReLU + maxpool(2,2)
    y = _conv3x3_relu(y, mu2_ref[...], md2_ref[...], w2_ref, b2_ref[...], fuse_k=True)
    y = _maxpool2x2(y, C2, sr2_ref, tl2_ref)                           # (BT*H/4, (W/4)*C2)

    # conv3 + ReLU
    y = _conv3x3_relu(y, mu3_ref[...], md3_ref[...], w3_ref, b3_ref[...], fuse_k=True)

    # AdaptiveAvgPool2d((1,1)): per-sample row sum, then per-channel lane average
    feat = jnp.dot(jnp.dot(rsum_ref[...], y, preferred_element_type=F32),
                   gap_ref[...], preferred_element_type=F32)           # (BT, C3)

    # fc head: Linear(64,128) -> ReLU -> Linear(128, 16 padded to 128)
    hdn = jnp.maximum(
        jnp.dot(feat, fc1w_ref[...], preferred_element_type=F32) + fc1b_ref[...], 0.0)
    o_ref[...] = (jnp.dot(hdn, fc2w_ref[...], preferred_element_type=F32)
                  + fc2b_ref[...])                                     # (BT, 128) lane-dense


# ----------------------- wrapper-side constant builders -----------------------

def _band_weight_stacked(wt, w_spatial):
    """wt: (cout, cin, 3, 3) torch-layout conv weight -> (3*w*cin, w*cout) with
    the dh=-1 / 0 / +1 banded block-Toeplitz matrices stacked along K.
    M_dh[w*cin + c, j*cout + o] = wt[o, c, dh+1, (w-j)+1] for |w-j| <= 1 else 0."""
    cin, cout = wt.shape[1], wt.shape[0]
    blocks = []
    for dh in (-1, 0, 1):
        m = jnp.zeros((w_spatial * cin, w_spatial * cout), F32)
        for dw in (-1, 0, 1):
            e = jnp.asarray(np.eye(w_spatial, k=-dw, dtype=np.float32))
            m = m + jnp.kron(e, jnp.transpose(wt[:, :, dh + 1, dw + 1]))
        blocks.append(m)
    return jnp.concatenate(blocks, axis=0)


def _border_masks(bt, h_s):
    """(bt*h_s, 1) masks zeroing the first / last row of every sample after a
    sublane roll of +1 / -1 (conv zero padding at the top/bottom sample edge)."""
    r = np.arange(bt * h_s) % h_s
    up = (r != 0).astype(np.float32)[:, None]
    dn = (r != h_s - 1).astype(np.float32)[:, None]
    return jnp.asarray(up), jnp.asarray(dn)


def _row_pool_selector(n):
    """(n//2, n) selector: out[r] = in[2r]."""
    r = np.arange(n // 2)[:, None]
    c = np.arange(n)[None, :]
    return jnp.asarray((c == 2 * r).astype(np.float32))


def _lane_pool_selector(w, c):
    """(w*c, (w//2)*c) selector keeping even w positions (lanes w-major, c-minor)."""
    p = np.arange(w * c)[:, None]
    q = np.arange((w // 2) * c)[None, :]
    sel = (((p // c) == 2 * (q // c)) & ((p % c) == (q % c))).astype(np.float32)
    return jnp.asarray(sel)


def _rowsum_mat(bt, h_s):
    """(bt, bt*h_s) per-sample row-sum matrix."""
    r = np.arange(bt)[:, None]
    c = np.arange(bt * h_s)[None, :]
    return jnp.asarray((c // h_s == r).astype(np.float32))


def _gap_mat(h, w, c):
    """(w*c, c) lane -> channel averaging matrix for AdaptiveAvgPool2d((1,1))."""
    p = np.arange(w * c)[:, None]
    q = np.arange(c)[None, :]
    return jnp.asarray(((p % c) == q).astype(np.float32) / float(h * w))


def _mm_flops(m, k, n):
    return 2 * m * k * n


# ----------------------------------- forward ----------------------------------

def transition_predictor_forward(x_nchw, params):
    """x_nchw: (B, 2, N_MELS, T) float32 -> (B, 16) control signals."""
    B, c_in, H, W = x_nchw.shape
    assert c_in == 2 and H % 4 == 0 and W % 4 == 0

    # Batch tile: fold BT samples into the matmul M (sublane) dimension.
    if B <= 16:
        bt, b_pad = B, B
    elif B % 16 == 0:
        bt, b_pad = 16, B
    elif B % 8 == 0:
        bt, b_pad = 8, B
    else:
        bt = 16
        b_pad = ((B + bt - 1) // bt) * bt
    if b_pad != B:
        x_nchw = jnp.pad(x_nchw, ((0, b_pad - B), (0, 0), (0, 0), (0, 0)))

    # NCHW -> NHWC -> lane-dense row slab (B*H, W*2), lanes (w-major, c-minor)
    x = jnp.transpose(x_nchw, (0, 2, 3, 1)).astype(F32).reshape(b_pad * H, W * c_in)

    H2, H4, W2, W4 = H // 2, H // 4, W // 2, W // 4

    w1 = _band_weight_stacked(params["conv1_w"], W)        # (3*W*2,    W*C1)
    w2 = _band_weight_stacked(params["conv2_w"], W2)       # (3*W2*C1,  W2*C2)
    w3 = _band_weight_stacked(params["conv3_w"], W4)       # (3*W4*C2,  W4*C3)
    b1 = jnp.tile(params["conv1_b"], W)[None, :]
    b2 = jnp.tile(params["conv2_b"], W2)[None, :]
    b3 = jnp.tile(params["conv3_b"], W4)[None, :]

    mu1, md1 = _border_masks(bt, H)
    mu2, md2 = _border_masks(bt, H2)
    mu3, md3 = _border_masks(bt, H4)

    sr1 = _row_pool_selector(bt * H)                        # (bt*H/2, bt*H)
    sr2 = _row_pool_selector(bt * H2)                       # (bt*H/4, bt*H/2)
    tl1 = _lane_pool_selector(W, C1)                        # (W*C1,  W2*C1)
    tl2 = _lane_pool_selector(W2, C2)                       # (W2*C2, W4*C2)

    rsum = _rowsum_mat(bt, H4)                              # (bt, bt*H4)
    gmat = _gap_mat(H4, W4, C3)                             # (W4*C3, C3)

    fc1w = params["fc1_w"]
    fc1b = params["fc1_b"][None, :]
    fc2w = jnp.zeros((D_FC, N_PAD), F32).at[:, :N_OUT].set(params["fc2_w"])
    fc2b = jnp.zeros((1, N_PAD), F32).at[:, :N_OUT].set(params["fc2_b"])

    ops = (w1, b1, mu1, md1, sr1, tl1,
           w2, b2, mu2, md2, sr2, tl2,
           w3, b3, mu3, md3,
           rsum, gmat, fc1w, fc1b, fc2w, fc2b)

    def _rep(a):        # full-array block, identical for every grid step (stays resident)
        zeros = (0,) * a.ndim
        return pl.BlockSpec(a.shape, lambda b: zeros)

    # Advisory cost: per-tile matmul FLOPs * number of tiles.
    n1, n2, n3 = bt * H, bt * H2, bt * H4
    L1, L1p, L2, L2p, L3 = W * C1, W2 * C1, W2 * C2, W4 * C2, W4 * C3
    flops_step = (3 * _mm_flops(n1, W * c_in, L1)
                  + _mm_flops(n2, n1, L1) + _mm_flops(n2, L1, L1p)
                  + _mm_flops(n2, 3 * L1p, L2)
                  + _mm_flops(n3, n2, L2) + _mm_flops(n3, L2, L2p)
                  + _mm_flops(n3, 3 * L2p, L3)
                  + _mm_flops(bt, n3, L3) + _mm_flops(bt, L3, C3)
                  + _mm_flops(bt, C3, D_FC) + _mm_flops(bt, D_FC, N_PAD))
    grid_n = b_pad // bt
    cost = pl.CostEstimate(
        flops=flops_step * grid_n,
        transcendentals=0,
        bytes_accessed=int(x.size * 4 + sum(int(a.size) * 4 for a in ops)
                           + b_pad * N_PAD * 4))

    out = pl.pallas_call(
        _fused_kernel,
        out_shape=jax.ShapeDtypeStruct((b_pad, N_PAD), F32),
        grid=(grid_n,),
        in_specs=[pl.BlockSpec((bt * H, W * c_in), lambda b: (b, 0))]
                 + [_rep(a) for a in ops],
        out_specs=pl.BlockSpec((bt, N_PAD), lambda b: (b, 0)),
        compiler_params=pltpu.CompilerParams(
            dimension_semantics=("parallel",)),
        # TODO(synk): on v7x, pltpu.CORE_PARALLEL on the batch axis would shard the
        # tiles across both TensorCores; kept "parallel" for portability.
        cost_estimate=cost,
    )(x, *ops)
    return out[:B, :N_OUT]


# --------------------------------- params / ref --------------------------------

def init_params(key):
    ks = jax.random.split(key, 8)

    def conv_init(kw, kb, cin, cout):
        bound = 1.0 / float(np.sqrt(9 * cin))
        w = jax.random.uniform(kw, (cout, cin, 3, 3), F32, -bound, bound)
        b = jax.random.uniform(kb, (cout,), F32, -bound, bound)
        return w, b

    w1, b1 = conv_init(ks[0], ks[1], 2, C1)
    w2, b2 = conv_init(ks[2], ks[3], C1, C2)
    w3, b3 = conv_init(ks[4], ks[5], C2, C3)
    return {
        "conv1_w": w1, "conv1_b": b1,
        "conv2_w": w2, "conv2_b": b2,
        "conv3_w": w3, "conv3_b": b3,
        # fc: nn.init.normal_(std=0.01), bias = 0 (stored as (in, out))
        "fc1_w": 0.01 * jax.random.normal(ks[6], (C3, D_FC), F32),
        "fc1_b": jnp.zeros((D_FC,), F32),
        "fc2_w": 0.01 * jax.random.normal(ks[7], (D_FC, N_OUT), F32),
        "fc2_b": jnp.zeros((N_OUT,), F32),
    }


def _reference_forward(x_nchw, params):
    # Pure-JAX/XLA reference of the same module (for the parity check).
    def conv(y, w, b):
        out = lax.conv_general_dilated(
            y, w, window_strides=(1, 1), padding=((1, 1), (1, 1)),
            dimension_numbers=("NCHW", "OIHW", "NCHW"))
        return jax.nn.relu(out + b[None, :, None, None])

    def pool(y):
        return lax.reduce_window(y, -jnp.inf, lax.max,
                                 (1, 1, 2, 2), (1, 1, 2, 2), "VALID")

    y = pool(conv(x_nchw, params["conv1_w"], params["conv1_b"]))
    y = pool(conv(y, params["conv2_w"], params["conv2_b"]))
    y = conv(y, params["conv3_w"], params["conv3_b"])
    feat = jnp.mean(y, axis=(2, 3))
    hdn = jax.nn.relu(feat @ params["fc1_w"] + params["fc1_b"])
    return hdn @ params["fc2_w"] + params["fc2_b"]


# ------------------------------------ main -------------------------------------

if __name__ == "__main__":
    key = jax.random.PRNGKey(0)
    k_x, k_p = jax.random.split(key)

    # (batch=2, channels=2 [S1, S2], N_MELS=16, T=16) -- NCHW like the PyTorch module
    x = jax.random.normal(k_x, (2, 2, 16, 16), dtype=jnp.float32)
    params = init_params(k_p)

    fwd = jax.jit(transition_predictor_forward)
    out = jax.block_until_ready(fwd(x, params))

    assert out.shape == (2, N_OUT), out.shape
    assert bool(jnp.all(jnp.isfinite(out)))

    # Parity vs. the XLA reference.  Tightened 5x vs. the previous 10% bound; the
    # remaining slack covers default-precision (bf16-pass) MXU/conv matmuls on
    # both paths — both compute in f32 otherwise.
    ref = jax.block_until_ready(_reference_forward(x, params))
    err = float(jnp.max(jnp.abs(out - ref)))
    scale = float(jnp.max(jnp.abs(ref))) + 1e-6
    assert err <= 2e-2 * scale + 1e-5, (err, scale)

    print("KERNEL_OK")
</pallas_src>

<mosaic_0001>
module attributes {stable_mosaic.version = 11 : i64} {
  func.func @_fused_kernel(%arg0: i32, %arg1: memref<32x32xf32, #tpu.memory_space<vmem>>, %arg2: memref<96x256xf32, #tpu.memory_space<vmem>>, %arg3: memref<1x256xf32, #tpu.memory_space<vmem>>, %arg4: memref<32x1xf32, #tpu.memory_space<vmem>>, %arg5: memref<32x1xf32, #tpu.memory_space<vmem>>, %arg6: memref<16x32xf32, #tpu.memory_space<vmem>>, %arg7: memref<256x128xf32, #tpu.memory_space<vmem>>, %arg8: memref<384x256xf32, #tpu.memory_space<vmem>>, %arg9: memref<1x256xf32, #tpu.memory_space<vmem>>, %arg10: memref<16x1xf32, #tpu.memory_space<vmem>>, %arg11: memref<16x1xf32, #tpu.memory_space<vmem>>, %arg12: memref<8x16xf32, #tpu.memory_space<vmem>>, %arg13: memref<256x128xf32, #tpu.memory_space<vmem>>, %arg14: memref<384x256xf32, #tpu.memory_space<vmem>>, %arg15: memref<1x256xf32, #tpu.memory_space<vmem>>, %arg16: memref<8x1xf32, #tpu.memory_space<vmem>>, %arg17: memref<8x1xf32, #tpu.memory_space<vmem>>, %arg18: memref<2x8xf32, #tpu.memory_space<vmem>>, %arg19: memref<256x64xf32, #tpu.memory_space<vmem>>, %arg20: memref<64x128xf32, #tpu.memory_space<vmem>>, %arg21: memref<1x128xf32, #tpu.memory_space<vmem>>, %arg22: memref<128x128xf32, #tpu.memory_space<vmem>>, %arg23: memref<1x128xf32, #tpu.memory_space<vmem>>, %arg24: memref<2x128xf32, #tpu.memory_space<vmem>>) attributes {dimension_semantics = [#tpu.dimension_semantics<parallel>], iteration_bounds = array<i64: 1>, scalar_prefetch = 0 : i64, scratch_operands = 0 : i64, tpu.core_type = #tpu.core_type<tc>, window_params = [{transform_indices = @transform_0, window_bounds = array<i64: 32, 32>}, {pipeline_mode = #tpu.pipeline_mode<synchronous>, transform_indices = @transform_1, window_bounds = array<i64: 96, 256>}, {pipeline_mode = #tpu.pipeline_mode<synchronous>, transform_indices = @transform_2, window_bounds = array<i64: 1, 256>}, {pipeline_mode = #tpu.pipeline_mode<synchronous>, transform_indices = @transform_3, window_bounds = array<i64: 32, 1>}, {pipeline_mode = #tpu.pipeline_mode<synchronous>, transform_indices = @transform_4, window_bounds = array<i64: 32, 1>}, {pipeline_mode = #tpu.pipeline_mode<synchronous>, transform_indices = @transform_5, window_bounds = array<i64: 16, 32>}, {pipeline_mode = #tpu.pipeline_mode<synchronous>, transform_indices = @transform_6, window_bounds = array<i64: 256, 128>}, {pipeline_mode = #tpu.pipeline_mode<synchronous>, transform_indices = @transform_7, window_bounds = array<i64: 384, 256>}, {pipeline_mode = #tpu.pipeline_mode<synchronous>, transform_indices = @transform_8, window_bounds = array<i64: 1, 256>}, {pipeline_mode = #tpu.pipeline_mode<synchronous>, transform_indices = @transform_9, window_bounds = array<i64: 16, 1>}, {pipeline_mode = #tpu.pipeline_mode<synchronous>, transform_indices = @transform_10, window_bounds = array<i64: 16, 1>}, {pipeline_mode = #tpu.pipeline_mode<synchronous>, transform_indices = @transform_11, window_bounds = array<i64: 8, 16>}, {pipeline_mode = #tpu.pipeline_mode<synchronous>, transform_indices = @transform_12, window_bounds = array<i64: 256, 128>}, {pipeline_mode = #tpu.pipeline_mode<synchronous>, transform_indices = @transform_13, window_bounds = array<i64: 384, 256>}, {pipeline_mode = #tpu.pipeline_mode<synchronous>, transform_indices = @transform_14, window_bounds = array<i64: 1, 256>}, {pipeline_mode = #tpu.pipeline_mode<synchronous>, transform_indices = @transform_15, window_bounds = array<i64: 8, 1>}, {pipeline_mode = #tpu.pipeline_mode<synchronous>, transform_indices = @transform_16, window_bounds = array<i64: 8, 1>}, {pipeline_mode = #tpu.pipeline_mode<synchronous>, transform_indices = @transform_17, window_bounds = array<i64: 2, 8>}, {pipeline_mode = #tpu.pipeline_mode<synchronous>, transform_indices = @transform_18, window_bounds = array<i64: 256, 64>}, {pipeline_mode = #tpu.pipeline_mode<synchronous>, transform_indices = @transform_19, window_bounds = array<i64: 64, 128>}, {pipeline_mode = #tpu.pipeline_mode<synchronous>, transform_indices = @transform_20, window_bounds = array<i64: 1, 128>}, {pipeline_mode = #tpu.pipeline_mode<synchronous>, transform_indices = @transform_21, window_bounds = array<i64: 128, 128>}, {pipeline_mode = #tpu.pipeline_mode<synchronous>, transform_indices = @transform_22, window_bounds = array<i64: 1, 128>}, {transform_indices = @transform_23, window_bounds = array<i64: 2, 128>}]} {
    %c0 = arith.constant 0 : index
    %c0_0 = arith.constant 0 : index
    %0 = vector.load %arg1[%c0, %c0_0] : memref<32x32xf32, #tpu.memory_space<vmem>>, vector<32x32xf32>
    %c0_1 = arith.constant 0 : index
    %c0_2 = arith.constant 0 : index
    %1 = vector.load %arg4[%c0_1, %c0_2] : memref<32x1xf32, #tpu.memory_space<vmem>>, vector<32x1xf32>
    %c0_3 = arith.constant 0 : index
    %c0_4 = arith.constant 0 : index
    %2 = vector.load %arg5[%c0_3, %c0_4] : memref<32x1xf32, #tpu.memory_space<vmem>>, vector<32x1xf32>
    %c0_5 = arith.constant 0 : index
    %c0_6 = arith.constant 0 : index
    %3 = vector.load %arg3[%c0_5, %c0_6] : memref<1x256xf32, #tpu.memory_space<vmem>>, vector<1x256xf32>
    %c1_i32 = arith.constant 1 : i32
    %4 = tpu.dynamic_rotate %0 by %c1_i32 dim 0 : vector<32x32xf32>, i32 -> vector<32x32xf32>
    %5 = vector.broadcast %1 : vector<32x1xf32> to vector<32x32xf32>
    %6 = arith.mulf %4, %5 : vector<32x32xf32>
    %c31_i32 = arith.constant 31 : i32
    %7 = tpu.dynamic_rotate %0 by %c31_i32 dim 0 : vector<32x32xf32>, i32 -> vector<32x32xf32>
    %8 = vector.broadcast %2 : vector<32x1xf32> to vector<32x32xf32>
    %9 = arith.mulf %7, %8 : vector<32x32xf32>
    %c0_7 = arith.constant 0 : index
    %c0_8 = arith.constant 0 : index
    %10 = vector.load %arg2[%c0_7, %c0_8] : memref<96x256xf32, #tpu.memory_space<vmem>>, vector<32x256xf32>
    %cst = arith.constant dense<0.000000e+00> : vector<32x256xf32>
    %11 = tpu.matmul %6, %10, %cst {dimension_numbers = #tpu.dot_dimension_numbers<[1], [0], [0], [1], [0, 0, 1, 1], [], []>} : vector<32x32xf32>, vector<32x256xf32>, vector<32x256xf32> -> vector<32x256xf32>
    %c32 = arith.constant 32 : index
    %c0_9 = arith.constant 0 : index
    %12 = vector.load %arg2[%c32, %c0_9] : memref<96x256xf32, #tpu.memory_space<vmem>>, vector<32x256xf32>
    %cst_10 = arith.constant dense<0.000000e+00> : vector<32x256xf32>
    %13 = tpu.matmul %0, %12, %cst_10 {dimension_numbers = #tpu.dot_dimension_numbers<[1], [0], [0], [1], [0, 0, 1, 1], [], []>} : vector<32x32xf32>, vector<32x256xf32>, vector<32x256xf32> -> vector<32x256xf32>
    %14 = arith.addf %11, %13 : vector<32x256xf32>
    %c64 = arith.constant 64 : index
    %c0_11 = arith.constant 0 : index
    %15 = vector.load %arg2[%c64, %c0_11] : memref<96x256xf32, #tpu.memory_space<vmem>>, vector<32x256xf32>
    %cst_12 = arith.constant dense<0.000000e+00> : vector<32x256xf32>
    %16 = tpu.matmul %9, %15, %cst_12 {dimension_numbers = #tpu.dot_dimension_numbers<[1], [0], [0], [1], [0, 0, 1, 1], [], []>} : vector<32x32xf32>, vector<32x256xf32>, vector<32x256xf32> -> vector<32x256xf32>
    %17 = arith.addf %14, %16 : vector<32x256xf32>
    %18 = vector.broadcast %3 : vector<1x256xf32> to vector<32x256xf32>
    %19 = arith.addf %17, %18 : vector<32x256xf32>
    %cst_13 = arith.constant 0.000000e+00 : f32
    %20 = vector.broadcast %cst_13 : f32 to vector<32x256xf32>
    %21 = arith.maximumf %19, %20 : vector<32x256xf32>
    %c31_i32_14 = arith.constant 31 : i32
    %22 = tpu.dynamic_rotate %21 by %c31_i32_14 dim 0 : vector<32x256xf32>, i32 -> vector<32x256xf32>
    %23 = arith.maximumf %21, %22 : vector<32x256xf32>
    %c0_15 = arith.constant 0 : index
    %c0_16 = arith.constant 0 : index
    %24 = vector.load %arg6[%c0_15, %c0_16] : memref<16x32xf32, #tpu.memory_space<vmem>>, vector<16x32xf32>
    %cst_17 = arith.constant dense<0.000000e+00> : vector<16x256xf32>
    %25 = tpu.matmul %24, %23, %cst_17 {dimension_numbers = #tpu.dot_dimension_numbers<[1], [0], [0], [1], [0, 0, 1, 1], [], []>} : vector<16x32xf32>, vector<32x256xf32>, vector<16x256xf32> -> vector<16x256xf32>
    %c240_i32 = arith.constant 240 : i32
    %26 = tpu.dynamic_rotate %25 by %c240_i32 dim 1 : vector<16x256xf32>, i32 -> vector<16x256xf32>
    %27 = arith.maximumf %25, %26 : vector<16x256xf32>
    %c0_18 = arith.constant 0 : index
    %c0_19 = arith.constant 0 : index
    %28 = vector.load %arg7[%c0_18, %c0_19] : memref<256x128xf32, #tpu.memory_space<vmem>>, vector<256x128xf32>
    %cst_20 = arith.constant dense<0.000000e+00> : vector<16x128xf32>
    %29 = tpu.matmul %27, %28, %cst_20 {dimension_numbers = #tpu.dot_dimension_numbers<[1], [0], [0], [1], [0, 0, 1, 1], [], []>} : vector<16x256xf32>, vector<256x128xf32>, vector<16x128xf32> -> vector<16x128xf32>
    %c0_21 = arith.constant 0 : index
    %c0_22 = arith.constant 0 : index
    %30 = vector.load %arg10[%c0_21, %c0_22] : memref<16x1xf32, #tpu.memory_space<vmem>>, vector<16x1xf32>
    %c0_23 = arith.constant 0 : index
    %c0_24 = arith.constant 0 : index
    %31 = vector.load %arg11[%c0_23, %c0_24] : memref<16x1xf32, #tpu.memory_space<vmem>>, vector<16x1xf32>
    %c0_25 = arith.constant 0 : index
    %c0_26 = arith.constant 0 : index
    %32 = vector.load %arg9[%c0_25, %c0_26] : memref<1x256xf32, #tpu.memory_space<vmem>>, vector<1x256xf32>
    %c1_i32_27 = arith.constant 1 : i32
    %33 = tpu.dynamic_rotate %29 by %c1_i32_27 dim 0 : vector<16x128xf32>, i32 -> vector<16x128xf32>
    %34 = vector.broadcast %30 : vector<16x1xf32> to vector<16x128xf32>
    %35 = arith.mulf %33, %34 : vector<16x128xf32>
    %c15_i32 = arith.constant 15 : i32
    %36 = tpu.dynamic_rotate %29 by %c15_i32 dim 0 : vector<16x128xf32>, i32 -> vector<16x128xf32>
    %37 = vector.broadcast %31 : vector<16x1xf32> to vector<16x128xf32>
    %38 = arith.mulf %36, %37 : vector<16x128xf32>
    %39 = tpu.concatenate %35, %29, %38 in 1 : vector<16x128xf32>, vector<16x128xf32>, vector<16x128xf32> -> vector<16x384xf32>
    %c0_28 = arith.constant 0 : index
    %c0_29 = arith.constant 0 : index
    %40 = vector.load %arg8[%c0_28, %c0_29] : memref<384x256xf32, #tpu.memory_space<vmem>>, vector<384x256xf32>
    %cst_30 = arith.constant dense<0.000000e+00> : vector<16x256xf32>
    %41 = tpu.matmul %39, %40, %cst_30 {dimension_numbers = #tpu.dot_dimension_numbers<[1], [0], [0], [1], [0, 0, 1, 1], [], []>} : vector<16x384xf32>, vector<384x256xf32>, vector<16x256xf32> -> vector<16x256xf32>
    %42 = vector.broadcast %32 : vector<1x256xf32> to vector<16x256xf32>
    %43 = arith.addf %41, %42 : vector<16x256xf32>
    %cst_31 = arith.constant 0.000000e+00 : f32
    %44 = vector.broadcast %cst_31 : f32 to vector<16x256xf32>
    %45 = arith.maximumf %43, %44 : vector<16x256xf32>
    %c15_i32_32 = arith.constant 15 : i32
    %46 = tpu.dynamic_rotate %45 by %c15_i32_32 dim 0 : vector<16x256xf32>, i32 -> vector<16x256xf32>
    %47 = arith.maximumf %45, %46 : vector<16x256xf32>
    %c0_33 = arith.constant 0 : index
    %c0_34 = arith.constant 0 : index
    %48 = vector.load %arg12[%c0_33, %c0_34] : memref<8x16xf32, #tpu.memory_space<vmem>>, vector<8x16xf32>
    %cst_35 = arith.constant dense<0.000000e+00> : vector<8x256xf32>
    %49 = tpu.matmul %48, %47, %cst_35 {dimension_numbers = #tpu.dot_dimension_numbers<[1], [0], [0], [1], [0, 0, 1, 1], [], []>} : vector<8x16xf32>, vector<16x256xf32>, vector<8x256xf32> -> vector<8x256xf32>
    %c224_i32 = arith.constant 224 : i32
    %50 = tpu.dynamic_rotate %49 by %c224_i32 dim 1 : vector<8x256xf32>, i32 -> vector<8x256xf32>
    %51 = arith.maximumf %49, %50 : vector<8x256xf32>
    %c0_36 = arith.constant 0 : index
    %c0_37 = arith.constant 0 : index
    %52 = vector.load %arg13[%c0_36, %c0_37] : memref<256x128xf32, #tpu.memory_space<vmem>>, vector<256x128xf32>
    %cst_38 = arith.constant dense<0.000000e+00> : vector<8x128xf32>
    %53 = tpu.matmul %51, %52, %cst_38 {dimension_numbers = #tpu.dot_dimension_numbers<[1], [0], [0], [1], [0, 0, 1, 1], [], []>} : vector<8x256xf32>, vector<256x128xf32>, vector<8x128xf32> -> vector<8x128xf32>
    %c0_39 = arith.constant 0 : index
    %c0_40 = arith.constant 0 : index
    %54 = vector.load %arg16[%c0_39, %c0_40] : memref<8x1xf32, #tpu.memory_space<vmem>>, vector<8x1xf32>
    %c0_41 = arith.constant 0 : index
    %c0_42 = arith.constant 0 : index
    %55 = vector.load %arg17[%c0_41, %c0_42] : memref<8x1xf32, #tpu.memory_space<vmem>>, vector<8x1xf32>
    %c0_43 = arith.constant 0 : index
    %c0_44 = arith.constant 0 : index
    %56 = vector.load %arg15[%c0_43, %c0_44] : memref<1x256xf32, #tpu.memory_space<vmem>>, vector<1x256xf32>
    %c1_i32_45 = arith.constant 1 : i32
    %57 = tpu.dynamic_rotate %53 by %c1_i32_45 dim 0 : vector<8x128xf32>, i32 -> vector<8x128xf32>
    %58 = vector.broadcast %54 : vector<8x1xf32> to vector<8x128xf32>
    %59 = arith.mulf %57, %58 : vector<8x128xf32>
    %c7_i32 = arith.constant 7 : i32
    %60 = tpu.dynamic_rotate %53 by %c7_i32 dim 0 : vector<8x128xf32>, i32 -> vector<8x128xf32>
    %61 = vector.broadcast %55 : vector<8x1xf32> to vector<8x128xf32>
    %62 = arith.mulf %60, %61 : vector<8x128xf32>
    %63 = tpu.concatenate %59, %53, %62 in 1 : vector<8x128xf32>, vector<8x128xf32>, vector<8x128xf32> -> vector<8x384xf32>
    %c0_46 = arith.constant 0 : index
    %c0_47 = arith.constant 0 : index
    %64 = vector.load %arg14[%c0_46, %c0_47] : memref<384x256xf32, #tpu.memory_space<vmem>>, vector<384x256xf32>
    %cst_48 = arith.constant dense<0.000000e+00> : vector<8x256xf32>
    %65 = tpu.matmul %63, %64, %cst_48 {dimension_numbers = #tpu.dot_dimension_numbers<[1], [0], [0], [1], [0, 0, 1, 1], [], []>} : vector<8x384xf32>, vector<384x256xf32>, vector<8x256xf32> -> vector<8x256xf32>
    %66 = vector.broadcast %56 : vector<1x256xf32> to vector<8x256xf32>
    %67 = arith.addf %65, %66 : vector<8x256xf32>
    %cst_49 = arith.constant 0.000000e+00 : f32
    %68 = vector.broadcast %cst_49 : f32 to vector<8x256xf32>
    %69 = arith.maximumf %67, %68 : vector<8x256xf32>
    %c0_50 = arith.constant 0 : index
    %c0_51 = arith.constant 0 : index
    %70 = vector.load %arg18[%c0_50, %c0_51] : memref<2x8xf32, #tpu.memory_space<vmem>>, vector<2x8xf32>
    %cst_52 = arith.constant dense<0.000000e+00> : vector<2x256xf32>
    %71 = tpu.matmul %70, %69, %cst_52 {dimension_numbers = #tpu.dot_dimension_numbers<[1], [0], [0], [1], [0, 0, 1, 1], [], []>} : vector<2x8xf32>, vector<8x256xf32>, vector<2x256xf32> -> vector<2x256xf32>
    %c0_53 = arith.constant 0 : index
    %c0_54 = arith.constant 0 : index
    %72 = vector.load %arg19[%c0_53, %c0_54] : memref<256x64xf32, #tpu.memory_space<vmem>>, vector<256x64xf32>
    %cst_55 = arith.constant dense<0.000000e+00> : vector<2x64xf32>
    %73 = tpu.matmul %71, %72, %cst_55 {dimension_numbers = #tpu.dot_dimension_numbers<[1], [0], [0], [1], [0, 0, 1, 1], [], []>} : vector<2x256xf32>, vector<256x64xf32>, vector<2x64xf32> -> vector<2x64xf32>
    %c0_56 = arith.constant 0 : index
    %c0_57 = arith.constant 0 : index
    %74 = vector.load %arg20[%c0_56, %c0_57] : memref<64x128xf32, #tpu.memory_space<vmem>>, vector<64x128xf32>
    %cst_58 = arith.constant dense<0.000000e+00> : vector<2x128xf32>
    %75 = tpu.matmul %73, %74, %cst_58 {dimension_numbers = #tpu.dot_dimension_numbers<[1], [0], [0], [1], [0, 0, 1, 1], [], []>} : vector<2x64xf32>, vector<64x128xf32>, vector<2x128xf32> -> vector<2x128xf32>
    %c0_59 = arith.constant 0 : index
    %c0_60 = arith.constant 0 : index
    %76 = vector.load %arg21[%c0_59, %c0_60] : memref<1x128xf32, #tpu.memory_space<vmem>>, vector<1x128xf32>
    %77 = vector.broadcast %76 : vector<1x128xf32> to vector<2x128xf32>
    %78 = arith.addf %75, %77 : vector<2x128xf32>
    %cst_61 = arith.constant 0.000000e+00 : f32
    %79 = vector.broadcast %cst_61 : f32 to vector<2x128xf32>
    %80 = arith.maximumf %78, %79 : vector<2x128xf32>
    %c0_62 = arith.constant 0 : index
    %c0_63 = arith.constant 0 : index
    %81 = vector.load %arg22[%c0_62, %c0_63] : memref<128x128xf32, #tpu.memory_space<vmem>>, vector<128x128xf32>
    %cst_64 = arith.constant dense<0.000000e+00> : vector<2x128xf32>
    %82 = tpu.matmul %80, %81, %cst_64 {dimension_numbers = #tpu.dot_dimension_numbers<[1], [0], [0], [1], [0, 0, 1, 1], [], []>} : vector<2x128xf32>, vector<128x128xf32>, vector<2x128xf32> -> vector<2x128xf32>
    %c0_65 = arith.constant 0 : index
    %c0_66 = arith.constant 0 : index
    %83 = vector.load %arg23[%c0_65, %c0_66] : memref<1x128xf32, #tpu.memory_space<vmem>>, vector<1x128xf32>
    %84 = vector.broadcast %83 : vector<1x128xf32> to vector<2x128xf32>
    %85 = arith.addf %82, %84 : vector<2x128xf32>
    %c0_67 = arith.constant 0 : index
    %c0_68 = arith.constant 0 : index
    %86 = vector.load %arg24[%c0_67, %c0_68] : memref<2x128xf32, #tpu.memory_space<vmem>>, vector<2x128xf32>
    tpu.vector_store %arg24[%c0_67, %c0_68], %85 {strides = array<i32>} : memref<2x128xf32, #tpu.memory_space<vmem>>, vector<2x128xf32>,
    return
  }
  func.func @transform_0(%arg0: i32) -> (i32, i32) {
    %c0_i32 = arith.constant 0 : i32
    %c0_i32_0 = arith.constant 0 : i32
    return %arg0, %c0_i32 : i32, i32
  }
  func.func @transform_1(%arg0: i32) -> (i32, i32) {
    %c0_i32 = arith.constant 0 : i32
    %c0_i32_0 = arith.constant 0 : i32
    %c0_i32_1 = arith.constant 0 : i32
    return %c0_i32, %c0_i32_0 : i32, i32
  }
  func.func @transform_2(%arg0: i32) -> (i32, i32) {
    %c0_i32 = arith.constant 0 : i32
    %c0_i32_0 = arith.constant 0 : i32
    %c0_i32_1 = arith.constant 0 : i32
    return %c0_i32, %c0_i32_0 : i32, i32
  }
  func.func @transform_3(%arg0: i32) -> (i32, i32) {
    %c0_i32 = arith.constant 0 : i32
    %c0_i32_0 = arith.constant 0 : i32
    %c0_i32_1 = arith.constant 0 : i32
    return %c0_i32, %c0_i32_0 : i32, i32
  }
  func.func @transform_4(%arg0: i32) -> (i32, i32) {
    %c0_i32 = arith.constant 0 : i32
    %c0_i32_0 = arith.constant 0 : i32
    %c0_i32_1 = arith.constant 0 : i32
    return %c0_i32, %c0_i32_0 : i32, i32
  }
  func.func @transform_5(%arg0: i32) -> (i32, i32) {
    %c0_i32 = arith.constant 0 : i32
    %c0_i32_0 = arith.constant 0 : i32
    %c0_i32_1 = arith.constant 0 : i32
    return %c0_i32, %c0_i32_0 : i32, i32
  }
  func.func @transform_6(%arg0: i32) -> (i32, i32) {
    %c0_i32 = arith.constant 0 : i32
    %c0_i32_0 = arith.constant 0 : i32
    %c0_i32_1 = arith.constant 0 : i32
    return %c0_i32, %c0_i32_0 : i32, i32
  }
  func.func @transform_7(%arg0: i32) -> (i32, i32) {
    %c0_i32 = arith.constant 0 : i32
    %c0_i32_0 = arith.constant 0 : i32
    %c0_i32_1 = arith.constant 0 : i32
    return %c0_i32, %c0_i32_0 : i32, i32
  }
  func.func @transform_8(%arg0: i32) -> (i32, i32) {
    %c0_i32 = arith.constant 0 : i32
    %c0_i32_0 = arith.constant 0 : i32
    %c0_i32_1 = arith.constant 0 : i32
    return %c0_i32, %c0_i32_0 : i32, i32
  }
  func.func @transform_9(%arg0: i32) -> (i32, i32) {
    %c0_i32 = arith.constant 0 : i32
    %c0_i32_0 = arith.constant 0 : i32
    %c0_i32_1 = arith.constant 0 : i32
    return %c0_i32, %c0_i32_0 : i32, i32
  }
  func.func @transform_10(%arg0: i32) -> (i32, i32) {
    %c0_i32 = arith.constant 0 : i32
    %c0_i32_0 = arith.constant 0 : i32
    %c0_i32_1 = arith.constant 0 : i32
    return %c0_i32, %c0_i32_0 : i32, i32
  }
  func.func @transform_11(%arg0: i32) -> (i32, i32) {
    %c0_i32 = arith.constant 0 : i32
    %c0_i32_0 = arith.constant 0 : i32
    %c0_i32_1 = arith.constant 0 : i32
    return %c0_i32, %c0_i32_0 : i32, i32
  }
  func.func @transform_12(%arg0: i32) -> (i32, i32) {
    %c0_i32 = arith.constant 0 : i32
    %c0_i32_0 = arith.constant 0 : i32
    %c0_i32_1 = arith.constant 0 : i32
    return %c0_i32, %c0_i32_0 : i32, i32
  }
  func.func @transform_13(%arg0: i32) -> (i32, i32) {
    %c0_i32 = arith.constant 0 : i32
    %c0_i32_0 = arith.constant 0 : i32
    %c0_i32_1 = arith.constant 0 : i32
    return %c0_i32, %c0_i32_0 : i32, i32
  }
  func.func @transform_14(%arg0: i32) -> (i32, i32) {
    %c0_i32 = arith.constant 0 : i32
    %c0_i32_0 = arith.constant 0 : i32
    %c0_i32_1 = arith.constant 0 : i32
    return %c0_i32, %c0_i32_0 : i32, i32
  }
  func.func @transform_15(%arg0: i32) -> (i32, i32) {
    %c0_i32 = arith.constant 0 : i32
    %c0_i32_0 = arith.constant 0 : i32
    %c0_i32_1 = arith.constant 0 : i32
    return %c0_i32, %c0_i32_0 : i32, i32
  }
  func.func @transform_16(%arg0: i32) -> (i32, i32) {
    %c0_i32 = arith.constant 0 : i32
    %c0_i32_0 = arith.constant 0 : i32
    %c0_i32_1 = arith.constant 0 : i32
    return %c0_i32, %c0_i32_0 : i32, i32
  }
  func.func @transform_17(%arg0: i32) -> (i32, i32) {
    %c0_i32 = arith.constant 0 : i32
    %c0_i32_0 = arith.constant 0 : i32
    %c0_i32_1 = arith.constant 0 : i32
    return %c0_i32, %c0_i32_0 : i32, i32
  }
  func.func @transform_18(%arg0: i32) -> (i32, i32) {
    %c0_i32 = arith.constant 0 : i32
    %c0_i32_0 = arith.constant 0 : i32
    %c0_i32_1 = arith.constant 0 : i32
    return %c0_i32, %c0_i32_0 : i32, i32
  }
  func.func @transform_19(%arg0: i32) -> (i32, i32) {
    %c0_i32 = arith.constant 0 : i32
    %c0_i32_0 = arith.constant 0 : i32
    %c0_i32_1 = arith.constant 0 : i32
    return %c0_i32, %c0_i32_0 : i32, i32
  }
  func.func @transform_20(%arg0: i32) -> (i32, i32) {
    %c0_i32 = arith.constant 0 : i32
    %c0_i32_0 = arith.constant 0 : i32
    %c0_i32_1 = arith.constant 0 : i32
    return %c0_i32, %c0_i32_0 : i32, i32
  }
  func.func @transform_21(%arg0: i32) -> (i32, i32) {
    %c0_i32 = arith.constant 0 : i32
    %c0_i32_0 = arith.constant 0 : i32
    %c0_i32_1 = arith.constant 0 : i32
    return %c0_i32, %c0_i32_0 : i32, i32
  }
  func.func @transform_22(%arg0: i32) -> (i32, i32) {
    %c0_i32 = arith.constant 0 : i32
    %c0_i32_0 = arith.constant 0 : i32
    %c0_i32_1 = arith.constant 0 : i32
    return %c0_i32, %c0_i32_0 : i32, i32
  }
  func.func @transform_23(%arg0: i32) -> (i32, i32) {
    %c0_i32 = arith.constant 0 : i32
    %c0_i32_0 = arith.constant 0 : i32
    return %arg0, %c0_i32 : i32, i32
  }
}

</mosaic_0001>

<bundles_post_ra>
// kernel: tile.18
= control target key start
LH: loop header
LB: loop body
LE: loop exit
PB: predicated region body
PF: predicated region fallthrough
CT: control target
= control target key end

     0   :  { %s28_s0 = inlined_call_operand.vmem [shape: f32[16], index: 0, kind: input, shape index: {}]   ;;  %s29_s1 = inlined_call_operand.vmem [shape: f32[16,16], index: 1, kind: output, shape index: {}]  }
   0x1   :  { %v4_v0 = vld [vmem:[%s28_s0] ss:$0 sm:$0xff] }
   0x2   :  { %5 = vst [vmem:[%s29_s1] sm:$0xff] %v4_v0  ;;  %8 = vst [vmem:[%s29_s1 + $0x8] sm:$0xff] %v4_v0 }

// kernel: tile.19
= control target key start
LH: loop header
LB: loop body
LE: loop exit
PB: predicated region body
PF: predicated region fallthrough
CT: control target
= control target key end

     0   :  { %s7_s6 = smov 3  ;;  %s21_s9 = smov 3  ;;  %vm4_vm0 = vcmask 130048   ;;  %vm11_vm1 = vcmask 1048448   ;;  %vm18_vm2 = vcmask 917248   ;;  %vm25_vm3 = vcmask 786048   ;;  %s128_s0 = inlined_call_operand.vmem [shape: f32[16,16], index: 0, kind: input, shape index: {}]   ;;  %s129_s1 = inlined_call_operand.vmem [shape: f32[1,256], index: 1, kind: output, shape index: {}]  }
   0x1   :  { %v66_v0 = vld [vmem:[%s128_s0 + $0x7] ss:$8 sm:%s7_s6]   ;;  %s81_s10 = smov 112   ;;  %v68_v1 = vld [vmem:[%s128_s0 + $0x5] ss:$8 sm:%s21_s9]   ;;  %s14_s13 = smov 3 }
   0x2   :  { %9 = vrot.lane.b32.xlu0 %v66_v0, %s81_s10  ;;  %s82_s14 = smov 80   ;;  %v67_v2 = vld [vmem:[%s128_s0 + $0x6] ss:$8 sm:%s14_s13]   ;;  %s28_s17 = smov 3  ;;  %vm32_vm4 = vcmask 654848   ;;  %vm39_vm5 = vcmask 523648  }
   0x3   :  { %23 = vrot.lane.b32.xlu1 %v68_v1, %s82_s14  ;;  %v69_v3 = vld [vmem:[%s128_s0 + $0x4] ss:$8 sm:%s28_s17]   ;;  %s35_s20 = smov 3  ;;  %s42_s21 = smov 3  ;;  %vm46_vm6 = vcmask 392448   ;;  %vm53_vm7 = vcmask 261248  }
   0x4   :  { %s83_s22 = smov 96   ;;  %s84_s23 = smov 64   ;;  %v70_v4 = vld [vmem:[%s128_s0 + $0x3] ss:$8 sm:%s35_s20]   ;;  %v71_v5 = vld [vmem:[%s128_s0 + $0x2] ss:$8 sm:%s42_s21]  }
   0x5   :  { %s2_s26 = smov 3  ;;  %s49_s29 = smov 3 }
   0x6   :  { %16 = vrot.lane.b32.xlu0 %v67_v2, %s83_s22  ;;  %v3_v6 = vld [vmem:[%s128_s0] ss:$8 sm:%s2_s26]   ;;  %s85_s3 = smov 48   ;;  %s86_s4 = smov 32  }
   0x7   :  { %30 = vrot.lane.b32.xlu1 %v69_v3, %s84_s23  ;;  %5 = vst.msk [vmem:[#allocation0] ss:$8 sm:$0x3] %vm4_vm0, %v3_v6   ;;  %v72_v7 = vld [vmem:[%s128_s0 + $0x1] ss:$8 sm:%s49_s29]   ;;  %s87_s0 = smov 16  }
   0xa   :  { %37 = vrot.lane.b32.xlu0 %v70_v4, %s85_s3 }
   0xb   :  { %44 = vrot.lane.b32.xlu1 %v71_v5, %s86_s4 }
   0xe   :  { %51 = vrot.lane.b32.xlu0 %v72_v7, %s87_s0 }
  0x74   :  { %v10_v8 = vpop.permute.xlu0 %9  }
  0x75   :  { %12 = vst.msk [vmem:[#allocation0] ss:$8 sm:$0x3] %vm11_vm1, %v10_v8   ;;  %v24_v9 = vpop.permute.xlu1 %23  }
  0x78   :  { %v17_v10 = vpop.permute.xlu0 %16  }
  0x79   :  { %19 = vst.msk [vmem:[#allocation0] ss:$8 sm:$0x3] %vm18_vm2, %v17_v10   ;;  %v31_v11 = vpop.permute.xlu1 %30  }
  0x7a   :  { %26 = vst.msk [vmem:[#allocation0] ss:$8 sm:$0x3] %vm25_vm3, %v24_v9  }
  0x7b   :  { %33 = vst.msk [vmem:[#allocation0] ss:$8 sm:$0x3] %vm32_vm4, %v31_v11  }
  0x7c   :  { %v38_v12 = vpop.permute.xlu0 %37  }
  0x7d   :  { %40 = vst.msk [vmem:[#allocation0] ss:$8 sm:$0x3] %vm39_vm5, %v38_v12   ;;  %v45_v13 = vpop.permute.xlu1 %44  }
  0x7e   :  { %47 = vst.msk [vmem:[#allocation0] ss:$8 sm:$0x3] %vm46_vm6, %v45_v13  }
  0x80   :  { %v52_v14 = vpop.permute.xlu0 %51  }
  0x81   :  { %54 = vst.msk [vmem:[#allocation0] ss:$8 sm:$0x3] %vm53_vm7, %v52_v14  }
  0x88   :  { %v58_v15 = vld [vmem:[#allocation0] sm:$0x1]  ;;  %v62_v16 = vld [vmem:[#allocation0 + $0x8] sm:$0x1] }
  0x89   :  { %60 = vst [vmem:[%s129_s1] sm:$0x1] %v58_v15  ;;  %73 = vst [vmem:[%s129_s1 + $0x1] sm:$0x1] %v62_v16 }

// kernel: tile.23
= control target key start
LH: loop header
LB: loop body
LE: loop exit
PB: predicated region body
PF: predicated region fallthrough
CT: control target
= control target key end

     0   :  { %s22_s0 = inlined_call_operand.vmem [shape: f32[32], index: 0, kind: input, shape index: {}]   ;;  %s23_s1 = inlined_call_operand.vmem [shape: f32[8,32], index: 1, kind: output, shape index: {}]  }
   0x1   :  { %v4_v0 = vld [vmem:[%s22_s0] ss:$0 sm:$0xff] }
   0x2   :  { %5 = vst [vmem:[%s23_s1] sm:$0xff] %v4_v0 }

// kernel: tile.24
= control target key start
LH: loop header
LB: loop body
LE: loop exit
PB: predicated region body
PF: predicated region fallthrough
CT: control target
= control target key end

     0   :  { %s7_s6 = smov 3  ;;  %s14_s9 = smov 3  ;;  %vm4_vm0 = vcmask 261120   ;;  %vm11_vm1 = vcmask 1048320   ;;  %vm18_vm2 = vcmask 785920   ;;  %vm25_vm3 = vcmask 523520   ;;  %s76_s0 = inlined_call_operand.vmem [shape: f32[8,32], index: 0, kind: input, shape index: {}]   ;;  %s77_s1 = inlined_call_operand.vmem [shape: f32[1,256], index: 1, kind: output, shape index: {}]  }
   0x1   :  { %v38_v0 = vld [vmem:[%s76_s0 + $0x3] ss:$4 sm:%s7_s6]   ;;  %s45_s10 = smov 96   ;;  %s21_s11 = smov 3  ;;  %v39_v1 = vld [vmem:[%s76_s0 + $0x2] ss:$4 sm:%s14_s9]  }
   0x2   :  { %9 = vrot.lane.b32.xlu0 %v38_v0, %s45_s10  ;;  %v40_v2 = vld [vmem:[%s76_s0 + $0x1] ss:$4 sm:%s21_s11]   ;;  %s2_s16 = smov 3  ;;  %s46_s17 = smov 32  }
   0x3   :  { %23 = vrot.lane.b32.xlu1 %v40_v2, %s46_s17  ;;  %v3_v3 = vld [vmem:[%s76_s0] ss:$4 sm:%s2_s16]   ;;  %s47_s0 = smov 64  }
   0x4   :  { %5 = vst.msk [vmem:[#allocation0] ss:$8 sm:$0x3] %vm4_vm0, %v3_v3  }
   0x6   :  { %16 = vrot.lane.b32.xlu0 %v39_v1, %s47_s0 }
  0x74   :  { %v10_v4 = vpop.permute.xlu0 %9  }
  0x75   :  { %12 = vst.msk [vmem:[#allocation0] ss:$8 sm:$0x3] %vm11_vm1, %v10_v4   ;;  %v24_v5 = vpop.permute.xlu1 %23  }
  0x78   :  { %v17_v6 = vpop.permute.xlu0 %16  }
  0x79   :  { %19 = vst.msk [vmem:[#allocation0] ss:$8 sm:$0x3] %vm18_vm2, %v17_v6  }
  0x7a   :  { %26 = vst.msk [vmem:[#allocation0] ss:$8 sm:$0x3] %vm25_vm3, %v24_v5  }
  0x81   :  { %v30_v7 = vld [vmem:[#allocation0] sm:$0x1]  ;;  %v34_v8 = vld [vmem:[#allocation0 + $0x8] sm:$0x1] }
  0x82   :  { %32 = vst [vmem:[%s77_s1] sm:$0x1] %v30_v7  ;;  %41 = vst [vmem:[%s77_s1 + $0x1] sm:$0x1] %v34_v8 }

// kernel: tile.28
= control target key start
LH: loop header
LB: loop body
LE: loop exit
PB: predicated region body
PF: predicated region fallthrough
CT: control target
= control target key end

     0   :  { %s22_s0 = inlined_call_operand.vmem [shape: f32[64], index: 0, kind: input, shape index: {}]   ;;  %s23_s1 = inlined_call_operand.vmem [shape: f32[4,64], index: 1, kind: output, shape index: {}]  }
   0x1   :  { %v4_v0 = vld [vmem:[%s22_s0] ss:$0 sm:$0xff] }
   0x2   :  { %5 = vst [vmem:[%s23_s1] sm:$0xf] %v4_v0 }

// kernel: tile.29
= control target key start
LH: loop header
LB: loop body
LE: loop exit
PB: predicated region body
PF: predicated region fallthrough
CT: control target
= control target key end

     0   :  { %s6_s8 = smov 3  ;;  %vm8_vm0 = vcmask 523264   ;;  %s30_s9 = smov 64   ;;  %vm15_vm1 = vcmask 1048064   ;;  %s50_s0 = inlined_call_operand.vmem [shape: f32[4,64], index: 0, kind: input, shape index: {}]   ;;  %s51_s1 = inlined_call_operand.vmem [shape: f32[1,256], index: 1, kind: output, shape index: {}]  }
   0x1   :  { %v4_v0 = vld [vmem:[%s50_s0] sm:$0xf]  ;;  %s11_s0 = smov 3 }
   0x2   :  { %5 = vst [vmem:[#allocation1] sm:$0xf] %v4_v0 }
   0x9   :  { %v12_v1 = vld [vmem:[#allocation1 + $0x1] ss:$2 sm:%s11_s0]   ;;  %v7_v2 = vld [vmem:[#allocation1] ss:$2 sm:%s6_s8]  }
   0xa   :  { %13 = vrot.lane.b32.xlu0 %v12_v1, %s30_s9  ;;  %9 = vst.msk [vmem:[#allocation0] ss:$8 sm:$0x3] %vm8_vm0, %v7_v2  }
  0x7c   :  { %v14_v3 = vpop.permute.xlu0 %13  }
  0x7d   :  { %16 = vst.msk [vmem:[#allocation0] ss:$8 sm:$0x3] %vm15_vm1, %v14_v3  }
  0x84   :  { %v20_v4 = vld [vmem:[#allocation0] sm:$0x1]  ;;  %v24_v5 = vld [vmem:[#allocation0 + $0x8] sm:$0x1] }
  0x85   :  { %22 = vst [vmem:[%s51_s1] sm:$0x1] %v20_v4  ;;  %28 = vst [vmem:[%s51_s1 + $0x1] sm:$0x1] %v24_v5 }

// kernel: transition_predictor_forward.1
= control target key start
LH: loop header
LB: loop body
LE: loop exit
PB: predicated region body
PF: predicated region fallthrough
CT: control target
= control target key end

     0   :  { %s3905_s0 = inlined_call_operand.vmem [shape: f32[32,32], index: 0, kind: input, shape index: {}]   ;;  %s3906_s1 = inlined_call_operand.vmem [shape: f32[96,256], index: 1, kind: input, shape index: {}]   ;;  %s3907_s2 = inlined_call_operand.vmem [shape: f32[1,256], index: 2, kind: input, shape index: {}]   ;;  %s3908_s3 = inlined_call_operand.vmem [shape: f32[32,1], index: 3, kind: input, shape index: {}]   ;;  %s3909_s4 = inlined_call_operand.vmem [shape: f32[32,1], index: 4, kind: input, shape index: {}]   ;;  %s3910_s5 = inlined_call_operand.vmem [shape: f32[16,32], index: 5, kind: input, shape index: {}]   ;;  %s3911_s6 = inlined_call_operand.vmem [shape: f32[256,128], index: 6, kind: input, shape index: {}]   ;;  %s3912_s7 = inlined_call_operand.vmem [shape: f32[384,256], index: 7, kind: input, shape index: {}]   ;;  %s3913_s8 = inlined_call_operand.vmem [shape: f32[1,256], index: 8, kind: input, shape index: {}]   ;;  %s3914_s9 = inlined_call_operand.vmem [shape: f32[16,1], index: 9, kind: input, shape index: {}]   ;;  %s3915_s10 = inlined_call_operand.vmem [shape: f32[16,1], index: 10, kind: input, shape index: {}]   ;;  %s3916_s11 = inlined_call_operand.vmem [shape: f32[8,16], index: 11, kind: input, shape index: {}]   ;;  %s3917_s12 = inlined_call_operand.vmem [shape: f32[256,128], index: 12, kind: input, shape index: {}]   ;;  %s3918_s13 = inlined_call_operand.vmem [shape: f32[384,256], index: 13, kind: input, shape index: {}]   ;;  %s3919_s14 = inlined_call_operand.vmem [shape: f32[1,256], index: 14, kind: input, shape index: {}]   ;;  %s3920_s15 = inlined_call_operand.vmem [shape: f32[8,1], index: 15, kind: input, shape index: {}]   ;;  %s3921_s16 = inlined_call_operand.vmem [shape: f32[8,1], index: 16, kind: input, shape index: {}]   ;;  %s3922_s17 = inlined_call_operand.vmem [shape: f32[2,8], index: 17, kind: input, shape index: {}]   ;;  %s3923_s18 = inlined_call_operand.vmem [shape: f32[256,64], index: 18, kind: input, shape index: {}]   ;;  %s3924_s19 = inlined_call_operand.vmem [shape: f32[64,128], index: 19, kind: input, shape index: {}]   ;;  %s3925_s20 = inlined_call_operand.vmem [shape: f32[1,128], index: 20, kind: input, shape index: {}]   ;;  %s3926_s21 = inlined_call_operand.vmem [shape: f32[128,128], index: 21, kind: input, shape index: {}]   ;;  %s3927_s22 = inlined_call_operand.vmem [shape: f32[1,128], index: 22, kind: input, shape index: {}]   ;;  %s3928_s23 = inlined_call_operand.hbm [shape: f32[2,128], index: 23, kind: output, shape index: {}]  }
   0x1   :  { %3936 = sst [smem:[#allocation5_spill]] %s3905_s0 }
   0x2   :  { %3937 = sst [smem:[#allocation6_spill]] %s3906_s1 }
   0x3   :  { %3938 = sst [smem:[#allocation7_spill]] %s3907_s2 }
   0x4   :  { %3939 = sst [smem:[#allocation8_spill]] %s3908_s3 }
   0x5   :  { %3940 = sst [smem:[#allocation9_spill]] %s3909_s4 }
   0x6   :  { %3941 = sst [smem:[#allocation10_spill]] %s3910_s5 }
   0x7   :  { %3942 = sst [smem:[#allocation11_spill]] %s3911_s6 }
   0x8   :  { %3943 = sst [smem:[#allocation12_spill]] %s3912_s7 }
   0x9   :  { %s3944_s24 = sld [smem:[#allocation8_spill]]  ;;  %v92_v2 = vlaneseq  ;;  %v2542_v3 = vmov 0   ;;  %s3945_s28 = sld [smem:[#allocation6_spill]]  ;;  %v2543_v10 = vmov 0.0  }
   0xa   :  { %2502 = vset.pattern.permute.xlu1 %v2542_v3  ;;  %2501 = vset.pattern.permute.xlu0 %v2542_v3  ;;  %s3946_s29 = sld [smem:[#allocation9_spill]]  ;;  %s3947_s25 = sld [smem:[#allocation5_spill]] }
   0xb   :  { %249 = vmatprep.mubr.f32.mxu0 %v2543_v10  ;;  %v2695_v11 = vshrl.u32 %v92_v2, 7  ;;  %615 = vmatprep.mubr.f32.mxu1 %v2543_v10 }
   0xd   :  { %vm127_vm0 = vcmp.lt.s32.totalorder %v2695_v11, 7  ;;  %vm94_vm1 = vcmp.lt.s32.totalorder %v2695_v11, 1 }
   0xf   :  { %v81_v0 = vld [vmem:[%s3944_s24 + $0x10] sm:$0xff]  ;;  %v79_v1 = vld [vmem:[%s3944_s24] sm:$0xff]  ;;  %v82_v4 = vld [vmem:[%s3944_s24 + $0x18] sm:$0xff] }
  0x10   :  { %111 = vperm.xlu1 %2502, %v81_v0   ;;  %101 = vperm.xlu0 %2501, %v79_v1   ;;  %v80_v5 = vld [vmem:[%s3944_s24 + $0x8] sm:$0xff]  ;;  %v167_v7 = vld [vmem:[%s3945_s28 + $0x58] sm:$0xff]  ;;  %v164_v8 = vld [vmem:[%s3945_s28 + $0x40] sm:$0xff] }
  0x11   :  { %v165_v6 = vld [vmem:[%s3945_s28 + $0x48] sm:$0xff]  ;;  %v166_v9 = vld [vmem:[%s3945_s28 + $0x50] sm:$0xff]  ;;  %v171_v15 = vld [vmem:[%s3945_s28 + $0x78] sm:$0xff] }
  0x12   :  { %v2106_v12 = vpack.c.bf16 %v167_v7, %v165_v6  ;;  %v2108_v13 = vpack.c.bf16 %v166_v9, %v164_v8  ;;  %v169_v14 = vld [vmem:[%s3945_s28 + $0x68] sm:$0xff]  ;;  %v168_v16 = vld [vmem:[%s3945_s28 + $0x60] sm:$0xff]  ;;  %v170_v19 = vld [vmem:[%s3945_s28 + $0x70] sm:$0xff] }
  0x13   :  { %v84_v17 = vld [vmem:[%s3946_s29 + $0x8] sm:$0xff]  ;;  %v2110_v18 = vpack.c.bf16 %v171_v15, %v169_v14  ;;  %v75_v20 = vld [vmem:[%s3947_s25] sm:$0xff]  ;;  %v159_v26 = vld [vmem:[%s3945_s28 + $0x18] sm:$0xff]  ;;  %v2112_v31 = vpack.c.bf16 %v170_v19, %v168_v16 }
  0x14   :  { %v76_v21 = vld [vmem:[%s3947_s25 + $0x8] sm:$0xff]  ;;  %116 = vperm.xlu1 %2502, %v82_v4   ;;  %106 = vperm.xlu0 %2501, %v80_v5   ;;  %v88_v22 = vrot.slane %v75_v20, 7  ;;  %v123_v23 = vrot.slane %v75_v20, 1  ;;  %v83_v27 = vld [vmem:[%s3946_s29] sm:$0xff]  ;;  %v77_v29 = vld [vmem:[%s3947_s25 + $0x10] sm:$0xff] }
  0x15   :  { %v89_v24 = vrot.slane %v76_v21, 7  ;;  %v157_v25 = vld [vmem:[%s3945_s28 + $0x8] sm:$0xff]  ;;  %2107 = vmatprep.subr.bf16.mxu0 %v2106_v12  ;;  %v124_v28 = vrot.slane %v76_v21, 1  ;;  %v78_v30 = vld [vmem:[%s3947_s25 + $0x18] sm:$0xff]  ;;  %v90_v32 = vrot.slane %v77_v29, 7  ;;  %v125_v33 = vrot.slane %v77_v29, 1 }
  0x16   :  { %2109 = vmatpush1.bf16.msra.mxu0 %v2108_v13  ;;  %v91_v34 = vrot.slane %v78_v30, 7  ;;  %v2114_v35 = vpack.c.bf16 %v159_v26, %v157_v25  ;;  %v156_v36 = vld [vmem:[%s3945_s28] sm:$0xff]  ;;  %v158_v37 = vld [vmem:[%s3945_s28 + $0x10] sm:$0xff]  ;;  %v126_v38 = vrot.slane %v78_v30, 1  ;;  %v161_v41 = vld [vmem:[%s3945_s28 + $0x28] sm:$0xff] }
  0x17   :  { %2111 = vmatprep.subr.bf16.mxu0 %v2110_v18  ;;  %v97_v39 = vsel %vm94_vm1, %v88_v22, %v89_v24  ;;  %v2746_v40 = vsel %vm127_vm0, %v123_v23, %v124_v28  ;;  %v163_v42 = vld [vmem:[%s3945_s28 + $0x38] sm:$0xff]  ;;  %v96_v43 = vsel %vm94_vm1, %v89_v24, %v90_v32 }
  0x18   :  { %139 = vperm.xlu1 %2502, %v84_v17   ;;  %134 = vperm.xlu0 %2501, %v83_v27   ;;  %v98_v44 = vsel %vm94_vm1, %v91_v34, %v88_v22 }
  0x19   :  { %28 = vsyncpa [#allocation3], 0  ;;  %v86_v45 = vld [vmem:[%s3946_s29 + $0x18] sm:$0xff]  ;;  %v85_v46 = vld [vmem:[%s3946_s29 + $0x10] sm:$0xff]  ;;  %v95_v47 = vsel %vm94_vm1, %v90_v32, %v91_v34  ;;  %v129_v48 = vsel %vm127_vm0, %v124_v28, %v125_v33  ;;  %vm172_vm2 = vcmask 261120   ;;  %v2116_v49 = vpack.c.bf16 %v158_v37, %v156_v36  ;;  %s3948_s2 = sld [smem:[#allocation7_spill]] }
  0x1a   :  { %2113 = vmatpush1.bf16.msra.mxu0 %v2112_v31  ;;  %v2118_v50 = vpack.c.bf16 %v163_v42, %v161_v41  ;;  %v160_v51 = vld [vmem:[%s3945_s28 + $0x20] sm:$0xff]  ;;  %v162_v52 = vld [vmem:[%s3945_s28 + $0x30] sm:$0xff]  ;;  %v131_v53 = vsel %vm127_vm0, %v126_v38, %v123_v23  ;;  %v128_v54 = vsel %vm127_vm0, %v125_v33, %v126_v38  ;;  %v376_v55 = vld [vmem:[%s3945_s28 + $0x88] sm:$0xff]  ;;  %v2827_v23 = vsub.s32 0, %v2695_v11  ;;  %s3949_s7 = sld [smem:[#allocation10_spill]]  ;;  %s3950_s24 = sld [smem:[#allocation11_spill]] }
  0x1b   :  { %2115 = vmatprep.subr.bf16.mxu0 %v2114_v35  ;;  %v378_v56 = vld [vmem:[%s3945_s28 + $0x98] sm:$0xff]  ;;  %v2120_v57 = vpack.c.bf16 %v162_v52, %v160_v51  ;;  %v375_v59 = vld [vmem:[%s3945_s28 + $0x80] sm:$0xff]  ;;  %v377_v60 = vld [vmem:[%s3945_s28 + $0x90] sm:$0xff]  ;;  %v2833_v25 = vsub.s32 1, %v2695_v11  ;;  %vm1069_vm4 = vcmask 130048   ;;  %s2545_s3 = smov 96  }
  0x1c   :  { %149 = vperm.xlu1 %2502, %v86_v45   ;;  %144 = vperm.xlu0 %2501, %v85_v46   ;;  %v2122_v58 = vpack.c.bf16 %v378_v56, %v376_v55  ;;  %v380_v61 = vld [vmem:[%s3945_s28 + $0xa8] sm:$0xff]  ;;  %v382_v62 = vld [vmem:[%s3945_s28 + $0xb8] sm:$0xff]  ;;  %v2124_v0 = vpack.c.bf16 %v377_v60, %v375_v59  ;;  %v379_v4 = vld [vmem:[%s3945_s28 + $0xa0] sm:$0xff]  ;;  %vm1524_vm6 = vcmask 64512   ;;  %vm2547_vm7 = vmmov 0   ;;  %s2548_s25 = smov [#allocation2]  }
  0x1d   :  { %1899 = vmatmul.mubr.msk.f32.vlgmr.msra.gmra.mrb[0].mxu0 %vm172_vm2, %v75_v20  ;;  %v2126_v3 = vpack.c.bf16 %v382_v62, %v380_v61  ;;  %v381_v5 = vld [vmem:[%s3945_s28 + $0xb0] sm:$0xff]  ;;  %s3951_s28 = sld [smem:[#allocation12_spill]]  ;;  %v1170_v11 = vld [vmem:[%s3917_s12 + $0x88] sm:$0xff]  ;;  %vm1716_vm8 = vcmask 523264  }
  0x1e   :  { %255 = vmatprep.mubr.f32.mxu0 %v2543_v10  ;;  %2117 = vmatpush1.bf16.msra.mxu0 %v2116_v49  ;;  %v2128_v7 = vpack.c.bf16 %v381_v5, %v379_v4 }
  0x1f   :  { %2119 = vmatprep.subr.bf16.mxu0 %v2118_v50  ;;  %v87_v24 = vld [vmem:[%s3948_s2] sm:$0x3]  ;;  %s2544_s2 = smov 112  }
  0x20   :  { %v496_v26 = vrot.slane %v87_v24, %v2827_v23  ;;  %v500_v27 = vrot.slane %v87_v24, %v2833_v25  ;;  %v647_v24 = vld [vmem:[%s3950_s24] sm:$0xff] }
  0x21   :  { %1900 = vmatmul.mubr.msk.f32.gmra.mrb[2].mxu0 %vm172_vm2, %v76_v21 }
  0x22   :  { %261 = vmatprep.mubr.f32.mxu0 %v2543_v10  ;;  %2121 = vmatpush1.bf16.msra.mxu0 %v2120_v57 }
  0x23   :  { %2123 = vmatprep.subr.bf16.mxu0 %v2122_v58 }
  0x25   :  { %1901 = vmatmul.mubr.msk.f32.gmra.mrb[4].mxu0 %vm172_vm2, %v77_v29 }
  0x26   :  { %267 = vmatprep.mubr.f32.mxu0 %v2543_v10 }
  0x29   :  { %1902 = vmatmul.mubr.msk.f32.gmra.mrb[6].mxu0 %vm172_vm2, %v78_v30 }
  0x2a   :  { %350 = vmatprep.mubr.f32.mxu0 %v2543_v10 }
  0x8f   :  { %v102_v63 = vpop.permute.xlu0 %101  ;;  %v112_v9 = vpop.permute.xlu1 %111 }
  0x90   :  { %v119_v1 = vmul.f32 %v102_v63, %v98_v44  ;;  %v121_v12 = vmul.f32 %v112_v9, %v96_v43 }
  0x92   :  { %1903 = vmatmul.mubr.msk.f32.vlgmr.msra.gmra.mrb[0].mxu0 %vm172_vm2, %v119_v1 }
  0x93   :  { %v107_v6 = vpop.permute.xlu0 %106  ;;  %356 = vmatprep.mubr.f32.mxu0 %v2543_v10  ;;  %2125 = vmatpush1.bf16.msra.mxu0 %v2124_v0  ;;  %v117_v13 = vpop.permute.xlu1 %116 }
  0x94   :  { %v120_v8 = vmul.f32 %v107_v6, %v97_v39  ;;  %2127 = vmatprep.subr.bf16.mxu0 %v2126_v3  ;;  %v122_v14 = vmul.f32 %v117_v13, %v95_v47 }
  0x96   :  { %1904 = vmatmul.mubr.msk.f32.gmra.mrb[2].mxu0 %vm172_vm2, %v120_v8 }
  0x97   :  { %362 = vmatprep.mubr.f32.mxu0 %v2543_v10  ;;  %2129 = vmatpush1.bf16.msra.mxu0 %v2128_v7  ;;  %v135_v15 = vpop.permute.xlu0 %134  ;;  %v140_v17 = vpop.permute.xlu1 %139 }
  0x98   :  { %v152_v16 = vmul.f32 %v135_v15, %v2746_v40  ;;  %v153_v18 = vmul.f32 %v140_v17, %v129_v48 }
  0x9a   :  { %1905 = vmatmul.mubr.msk.f32.gmra.mrb[4].mxu0 %vm172_vm2, %v121_v12 }
  0x9b   :  { %368 = vmatprep.mubr.f32.mxu0 %v2543_v10  ;;  %v145_v19 = vpop.permute.xlu0 %144  ;;  %v150_v21 = vpop.permute.xlu1 %149 }
  0x9c   :  { %v154_v20 = vmul.f32 %v145_v19, %v128_v54  ;;  %v155_v22 = vmul.f32 %v150_v21, %v131_v53  ;;  %v543_v19 = vld [vmem:[%s3949_s7] sm:$0xff] }
  0x9d   :  { %v663_v21 = vld [vmem:[%s3950_s24 + $0x80] sm:$0xff] }
  0x9e   :  { %1906 = vmatmul.mubr.msk.f32.gmra.mrb[6].mxu0 %vm172_vm2, %v122_v14 }
  0x9f   :  { %459 = vmatprep.mubr.f32.mxu0 %v2543_v10 }
  0xa2   :  { %1907 = vmatmul.mubr.msk.f32.vlgmr.msra.gmra.mrb[0].mxu0 %vm172_vm2, %v152_v16 }
  0xa3   :  { %465 = vmatprep.mubr.f32.mxu0 %v2543_v10 }
  0xa6   :  { %1908 = vmatmul.mubr.msk.f32.gmra.mrb[2].mxu0 %vm172_vm2, %v153_v18 }
  0xa7   :  { %471 = vmatprep.mubr.f32.mxu0 %v2543_v10 }
  0xaa   :  { %1909 = vmatmul.mubr.msk.f32.gmra.mrb[4].mxu0 %vm172_vm2, %v154_v20  ;;  %v544_v20 = vld [vmem:[%s3949_s7 + $0x8] sm:$0xff] }
  0xab   :  { %477 = vmatprep.mubr.f32.mxu0 %v2543_v10 }
  0xae   :  { %1910 = vmatmul.mubr.msk.f32.gmra.mrb[6].mxu0 %vm172_vm2, %v155_v22  ;;  %v664_v22 = vld [vmem:[%s3950_s24 + $0x88] sm:$0xff] }
 0x175   :  { %v461_v28 = vpop.f32.mrb[0].mxu0 }
 0x176   :  { %v503_v29 = vadd.f32 %v496_v26, %v461_v28  ;;  %v463_v30 = vpop.f32.mrb[1].mxu0  ;;  %v665_v28 = vld [vmem:[%s3950_s24 + $0x90] sm:$0xff] }
 0x177   :  { %v504_v31 = vadd.f32 %v500_v27, %v463_v30 }
 0x178   :  { %v511_v33 = vmax.f32 %v503_v29, 0.0  ;;  %v666_v29 = vld [vmem:[%s3950_s24 + $0x98] sm:$0xff] }
 0x179   :  { %v467_v32 = vpop.f32.mrb[2].mxu0  ;;  %v512_v36 = vmax.f32 %v504_v31, 0.0  ;;  %v2142_v31 = vpack.c.bf16 %v666_v29, %v665_v28  ;;  %v796_v28 = vld [vmem:[%s3951_s28 + $0x28] sm:$0xff]  ;;  %v798_v29 = vld [vmem:[%s3951_s28 + $0x38] sm:$0xff] }
 0x17a   :  { %v505_v34 = vadd.f32 %v496_v26, %v467_v32  ;;  %v469_v35 = vpop.f32.mrb[3].mxu0  ;;  %v519_v41 = vrot.slane %v511_v33, 1  ;;  %v649_v32 = vld [vmem:[%s3950_s24 + $0x10] sm:$0xff] }
 0x17b   :  { %v506_v37 = vadd.f32 %v500_v27, %v469_v35  ;;  %v520_v45 = vrot.slane %v512_v36, 1  ;;  %v668_v35 = vld [vmem:[%s3950_s24 + $0xa8] sm:$0xff] }
 0x17c   :  { %v513_v38 = vmax.f32 %v505_v34, 0.0  ;;  %v667_v34 = vld [vmem:[%s3950_s24 + $0xa0] sm:$0xff] }
 0x17d   :  { %v514_v39 = vmax.f32 %v506_v37, 0.0  ;;  %v473_v40 = vpop.f32.mrb[4].mxu0  ;;  %v2146_v37 = vpack.c.bf16 %v668_v35, %v667_v34  ;;  %v800_v34 = vld [vmem:[%s3951_s28 + $0x48] sm:$0xff]  ;;  %v802_v35 = vld [vmem:[%s3951_s28 + $0x58] sm:$0xff] }
 0x17e   :  { %v521_v42 = vrot.slane %v513_v38, 1  ;;  %v507_v43 = vadd.f32 %v496_v26, %v473_v40  ;;  %v475_v44 = vpop.f32.mrb[5].mxu0  ;;  %v669_v40 = vld [vmem:[%s3950_s24 + $0xb0] sm:$0xff] }
 0x17f   :  { %v522_v46 = vrot.slane %v514_v39, 1  ;;  %v508_v47 = vadd.f32 %v500_v27, %v475_v44  ;;  %v653_v44 = vld [vmem:[%s3950_s24 + $0x30] sm:$0xff] }
 0x180   :  { %v515_v48 = vmax.f32 %v507_v43, 0.0  ;;  %v531_v49 = vsel %vm127_vm0, %v519_v41, %v521_v42 }
 0x181   :  { %v516_v50 = vmax.f32 %v508_v47, 0.0  ;;  %v479_v51 = vpop.f32.mrb[6].mxu0  ;;  %v532_v52 = vsel %vm127_vm0, %v520_v45, %v522_v46  ;;  %v535_v53 = vmax.f32 %v511_v33, %v531_v49  ;;  %v650_v33 = vld [vmem:[%s3950_s24 + $0x18] sm:$0xff]  ;;  %v672_v47 = vld [vmem:[%s3950_s24 + $0xc8] sm:$0xff] }
 0x182   :  { %v523_v54 = vrot.slane %v515_v48, 1  ;;  %v509_v55 = vadd.f32 %v496_v26, %v479_v51  ;;  %v481_v56 = vpop.f32.mrb[7].mxu0  ;;  %v536_v57 = vmax.f32 %v512_v36, %v532_v52  ;;  %v2138_v26 = vpack.c.bf16 %v664_v22, %v663_v21  ;;  %v656_v51 = vld [vmem:[%s3950_s24 + $0x48] sm:$0xff]  ;;  %v673_v52 = vld [vmem:[%s3950_s24 + $0xd0] sm:$0xff]  ;;  %v794_v22 = vld [vmem:[%s3951_s28 + $0x18] sm:$0xff] }
 0x183   :  { %v524_v58 = vrot.slane %v516_v50, 1  ;;  %v510_v59 = vadd.f32 %v500_v27, %v481_v56  ;;  %v648_v27 = vld [vmem:[%s3950_s24 + $0x8] sm:$0xff]  ;;  %v2144_v36 = vpack.c.bf16 %v650_v33, %v649_v32  ;;  %v657_v56 = vld [vmem:[%s3950_s24 + $0x50] sm:$0xff]  ;;  %v795_v32 = vld [vmem:[%s3951_s28 + $0x20] sm:$0xff] }
 0x184   :  { %v517_v60 = vmax.f32 %v509_v55, 0.0  ;;  %v529_v61 = vsel %vm127_vm0, %v521_v42, %v523_v54  ;;  %v2140_v30 = vpack.c.bf16 %v648_v27, %v647_v24  ;;  %v792_v21 = vld [vmem:[%s3951_s28 + $0x8] sm:$0xff]  ;;  %v791_v24 = vld [vmem:[%s3951_s28] sm:$0xff]  ;;  %v793_v27 = vld [vmem:[%s3951_s28 + $0x10] sm:$0xff] }
 0x185   :  { %v518_v62 = vmax.f32 %v510_v59, 0.0  ;;  %v530_v63 = vsel %vm127_vm0, %v522_v46, %v524_v58  ;;  %v537_v0 = vmax.f32 %v513_v38, %v529_v61  ;;  %v651_v38 = vld [vmem:[%s3950_s24 + $0x20] sm:$0xff]  ;;  %v676_v59 = vld [vmem:[%s3950_s24 + $0xe8] sm:$0xff]  ;;  %v797_v33 = vld [vmem:[%s3951_s28 + $0x30] sm:$0xff] }
 0x186   :  { %v525_v1 = vrot.slane %v517_v60, 1  ;;  %v538_v3 = vmax.f32 %v514_v39, %v530_v63  ;;  %v652_v39 = vld [vmem:[%s3950_s24 + $0x28] sm:$0xff]  ;;  %v671_v46 = vld [vmem:[%s3950_s24 + $0xc0] sm:$0xff] }
 0x187   :  { %v526_v4 = vrot.slane %v518_v62, 1  ;;  %v2132_v5 = vpack.c.bf16 %v537_v0, %v535_v53  ;;  %v2148_v42 = vpack.c.bf16 %v652_v39, %v651_v38  ;;  %v2154_v49 = vpack.c.bf16 %v672_v47, %v671_v46  ;;  %v674_v53 = vld [vmem:[%s3950_s24 + $0xd8] sm:$0xff]  ;;  %v660_v63 = vld [vmem:[%s3950_s24 + $0x68] sm:$0xff]  ;;  %v799_v38 = vld [vmem:[%s3951_s28 + $0x40] sm:$0xff] }
 0x188   :  { %v533_v6 = vsel %vm127_vm0, %v525_v1, %v519_v41  ;;  %v2130_v7 = vpack.c.bf16 %v538_v3, %v536_v57  ;;  %v527_v8 = vsel %vm127_vm0, %v523_v54, %v525_v1  ;;  %v670_v41 = vld [vmem:[%s3950_s24 + $0xb8] sm:$0xff]  ;;  %v2158_v55 = vpack.c.bf16 %v674_v53, %v673_v52  ;;  %v677_v1 = vld [vmem:[%s3950_s24 + $0xf0] sm:$0xff]  ;;  %v808_v46 = vld [vmem:[%s3951_s28 + $0x88] sm:$0xff] }
 0x189   :  { %v541_v9 = vmax.f32 %v517_v60, %v533_v6  ;;  %v534_v12 = vsel %vm127_vm0, %v526_v4, %v520_v45  ;;  %v528_v13 = vsel %vm127_vm0, %v524_v58, %v526_v4  ;;  %v539_v14 = vmax.f32 %v515_v48, %v527_v8  ;;  %v654_v45 = vld [vmem:[%s3950_s24 + $0x38] sm:$0xff]  ;;  %v675_v58 = vld [vmem:[%s3950_s24 + $0xe0] sm:$0xff]  ;;  %v801_v39 = vld [vmem:[%s3951_s28 + $0x50] sm:$0xff] }
 0x18a   :  { %v542_v15 = vmax.f32 %v518_v62, %v534_v12  ;;  %2131 = vmatprep.subr.bf16.mxu1 %v2130_v7  ;;  %v540_v16 = vmax.f32 %v516_v50, %v528_v13  ;;  %v2150_v43 = vpack.c.bf16 %v670_v41, %v669_v40  ;;  %v2152_v48 = vpack.c.bf16 %v654_v45, %v653_v44  ;;  %v655_v50 = vld [vmem:[%s3950_s24 + $0x40] sm:$0xff]  ;;  %v658_v57 = vld [vmem:[%s3950_s24 + $0x58] sm:$0xff]  ;;  %v804_v40 = vld [vmem:[%s3951_s28 + $0x68] sm:$0xff] }
 0x18b   :  { %2133 = vmatpush1.bf16.msra.mxu1 %v2132_v5  ;;  %v2136_v17 = vpack.c.bf16 %v541_v9, %v539_v14  ;;  %v2156_v54 = vpack.c.bf16 %v656_v51, %v655_v50  ;;  %v2160_v60 = vpack.c.bf16 %v658_v57, %v657_v56  ;;  %v2162_v61 = vpack.c.bf16 %v676_v59, %v675_v58  ;;  %v659_v62 = vld [vmem:[%s3950_s24 + $0x60] sm:$0xff]  ;;  %v678_v3 = vld [vmem:[%s3950_s24 + $0xf8] sm:$0xff]  ;;  %v661_v5 = vld [vmem:[%s3950_s24 + $0x70] sm:$0xff] }
 0x18c   :  { %v2134_v18 = vpack.c.bf16 %v542_v15, %v540_v16  ;;  %v2164_v0 = vpack.c.bf16 %v660_v63, %v659_v62  ;;  %v2166_v4 = vpack.c.bf16 %v678_v3, %v677_v1  ;;  %v662_v6 = vld [vmem:[%s3950_s24 + $0x78] sm:$0xff]  ;;  %v754_v15 = vld [vmem:[%s3914_s9] sm:$0xff]  ;;  %v805_v45 = vld [vmem:[%s3951_s28 + $0x70] sm:$0xff] }
 0x18d   :  { %v2168_v7 = vpack.c.bf16 %v662_v6, %v661_v5  ;;  %v806_v41 = vld [vmem:[%s3951_s28 + $0x78] sm:$0xff]  ;;  %v803_v44 = vld [vmem:[%s3951_s28 + $0x60] sm:$0xff]  ;;  %v809_v51 = vld [vmem:[%s3951_s28 + $0x90] sm:$0xff] }
 0x18e   :  { %2135 = vmatprep.subr.bf16.mxu1 %v2134_v18  ;;  %v755_v18 = vld [vmem:[%s3914_s9 + $0x8] sm:$0xff]  ;;  %v810_v47 = vld [vmem:[%s3951_s28 + $0x98] sm:$0xff]  ;;  %v807_v50 = vld [vmem:[%s3951_s28 + $0x80] sm:$0xff] }
 0x18f   :  { %2137 = vmatpush1.bf16.msra.mxu1 %v2136_v17  ;;  %v756_v17 = vld [vmem:[%s3915_s10] sm:$0xff]  ;;  %v812_v52 = vld [vmem:[%s3951_s28 + $0xa8] sm:$0xff]  ;;  %v814_v53 = vld [vmem:[%s3951_s28 + $0xb8] sm:$0xff] }
 0x190   :  { %2139 = vmatprep.subr.bf16.mxu1 %v2138_v26  ;;  %v2170_v26 = vpack.c.bf16 %v794_v22, %v792_v21  ;;  %v811_v56 = vld [vmem:[%s3951_s28 + $0xa0] sm:$0xff]  ;;  %v813_v57 = vld [vmem:[%s3951_s28 + $0xb0] sm:$0xff]  ;;  %v816_v58 = vld [vmem:[%s3951_s28 + $0xc8] sm:$0xff] }
 0x191   :  { %v818_v59 = vld [vmem:[%s3951_s28 + $0xd8] sm:$0xff]  ;;  %v815_v62 = vld [vmem:[%s3951_s28 + $0xc0] sm:$0xff]  ;;  %v817_v63 = vld [vmem:[%s3951_s28 + $0xd0] sm:$0xff] }
 0x192   :  { %1911 = vmatmul.mubr.msk.f32.vlgmr.msra.gmra.mrb[0].mxu1 %vm172_vm2, %v543_v19  ;;  %v757_v19 = vld [vmem:[%s3915_s10 + $0x8] sm:$0xff]  ;;  %2171 = vmatprep.subr.bf16.mxu0 %v2170_v26  ;;  %v822_v1 = vld [vmem:[%s3951_s28 + $0xf8] sm:$0xff]  ;;  %v2196_v3 = vpack.c.bf16 %v817_v63, %v815_v62  ;;  %v819_v5 = vld [vmem:[%s3951_s28 + $0xe0] sm:$0xff] }
 0x193   :  { %621 = vmatprep.mubr.f32.mxu1 %v2543_v10  ;;  %2141 = vmatpush3.bf16.msra.mxu1 %v2140_v30  ;;  %v2172_v30 = vpack.c.bf16 %v793_v27, %v791_v24  ;;  %v821_v6 = vld [vmem:[%s3951_s28 + $0xf0] sm:$0xff]  ;;  %v827_v24 = vld [vmem:[%s3951_s28 + $0x120] sm:$0xff]  ;;  %v832_v27 = vld [vmem:[%s3951_s28 + $0x148] sm:$0xff] }
 0x194   :  { %2143 = vmatprep.subr.bf16.mxu1 %v2142_v31  ;;  %v2174_v31 = vpack.c.bf16 %v798_v29, %v796_v28  ;;  %v829_v26 = vld [vmem:[%s3951_s28 + $0x130] sm:$0xff]  ;;  %v834_v28 = vld [vmem:[%s3951_s28 + $0x158] sm:$0xff]  ;;  %v848_v62 = vld [vmem:[%s3951_s28 + $0x1c8] sm:$0xff] }
 0x195   :  { %2173 = vmatpush1.bf16.msra.mxu0 %v2172_v30  ;;  %v2208_v29 = vpack.c.bf16 %v829_v26, %v827_v24  ;;  %v2210_v30 = vpack.c.bf16 %v834_v28, %v832_v27  ;;  %v850_v63 = vld [vmem:[%s3951_s28 + $0x1d8] sm:$0xff]  ;;  %v855_v28 = vld [vmem:[%s3951_s28 + $0x200] sm:$0xff] }
 0x196   :  { %1912 = vmatmul.mubr.msk.f32.gmra.mrb[2].mxu1 %vm172_vm2, %v544_v20  ;;  %v1255_v20 = vld [vmem:[%s3920_s15] sm:$0xff]  ;;  %2175 = vmatprep.subr.bf16.mxu0 %v2174_v31 }
 0x197   :  { %2145 = vmatpush3.bf16.msra.mxu1 %v2144_v36  ;;  %v2176_v36 = vpack.c.bf16 %v797_v33, %v795_v32  ;;  %v831_v31 = vld [vmem:[%s3951_s28 + $0x140] sm:$0xff]  ;;  %v833_v32 = vld [vmem:[%s3951_s28 + $0x150] sm:$0xff]  ;;  %v836_v33 = vld [vmem:[%s3951_s28 + $0x168] sm:$0xff] }
 0x198   :  { %2147 = vmatprep.subr.bf16.mxu1 %v2146_v37  ;;  %v2178_v37 = vpack.c.bf16 %v802_v35, %v800_v34  ;;  %v838_v34 = vld [vmem:[%s3951_s28 + $0x178] sm:$0xff]  ;;  %v2212_v35 = vpack.c.bf16 %v833_v32, %v831_v31 }
 0x199   :  { %2177 = vmatpush1.bf16.msra.mxu0 %v2176_v36  ;;  %v2214_v36 = vpack.c.bf16 %v838_v34, %v836_v33  ;;  %v860_v34 = vld [vmem:[%s3951_s28 + $0x228] sm:$0xff] }
 0x19a   :  { %2179 = vmatprep.subr.bf16.mxu0 %v2178_v37  ;;  %v835_v37 = vld [vmem:[%s3951_s28 + $0x160] sm:$0xff] }
 0x19b   :  { %2149 = vmatpush3.bf16.msra.mxu1 %v2148_v42  ;;  %v2180_v42 = vpack.c.bf16 %v801_v39, %v799_v38  ;;  %v837_v38 = vld [vmem:[%s3951_s28 + $0x170] sm:$0xff]  ;;  %v840_v39 = vld [vmem:[%s3951_s28 + $0x188] sm:$0xff] }
 0x19c   :  { %2151 = vmatprep.subr.bf16.mxu1 %v2150_v43  ;;  %v2182_v43 = vpack.c.bf16 %v806_v41, %v804_v40  ;;  %v842_v40 = vld [vmem:[%s3951_s28 + $0x198] sm:$0xff]  ;;  %v2216_v41 = vpack.c.bf16 %v837_v38, %v835_v37 }
 0x19d   :  { %2181 = vmatpush1.bf16.msra.mxu0 %v2180_v42  ;;  %v2218_v42 = vpack.c.bf16 %v842_v40, %v840_v39 }
 0x19e   :  { %2183 = vmatprep.subr.bf16.mxu0 %v2182_v43  ;;  %v839_v43 = vld [vmem:[%s3951_s28 + $0x180] sm:$0xff] }
 0x19f   :  { %2153 = vmatpush3.bf16.msra.mxu1 %v2152_v48  ;;  %v2184_v48 = vpack.c.bf16 %v805_v45, %v803_v44  ;;  %v841_v44 = vld [vmem:[%s3951_s28 + $0x190] sm:$0xff] }
 0x1a0   :  { %2155 = vmatprep.subr.bf16.mxu1 %v2154_v49  ;;  %v2186_v49 = vpack.c.bf16 %v810_v47, %v808_v46  ;;  %v2220_v45 = vpack.c.bf16 %v841_v44, %v839_v43  ;;  %v3142_v46 = vand.u32 127, %v92_v2  ;;  %v859_v44 = vld [vmem:[%s3951_s28 + $0x220] sm:$0xff] }
 0x1a1   :  { %2185 = vmatpush1.bf16.msra.mxu0 %v2184_v48 }
 0x1a2   :  { %2187 = vmatprep.subr.bf16.mxu0 %v2186_v49  ;;  %vm638_vm3 = vcmp.lt.s32.totalorder %v3142_v46, 112  ;;  %vm1148_vm5 = vcmp.lt.s32.totalorder %v3142_v46, 96 }
 0x1a3   :  { %2157 = vmatpush3.bf16.msra.mxu1 %v2156_v54  ;;  %v2188_v54 = vpack.c.bf16 %v809_v51, %v807_v50 }
 0x1a4   :  { %2159 = vmatprep.subr.bf16.mxu1 %v2158_v55  ;;  %v2190_v55 = vpack.c.bf16 %v814_v53, %v812_v52 }
 0x1a5   :  { %2189 = vmatpush1.bf16.msra.mxu0 %v2188_v54 }
 0x1a6   :  { %2191 = vmatprep.subr.bf16.mxu0 %v2190_v55 }
 0x1a7   :  { %2161 = vmatpush3.bf16.msra.mxu1 %v2160_v60  ;;  %v2192_v60 = vpack.c.bf16 %v813_v57, %v811_v56 }
 0x1a8   :  { %2163 = vmatprep.subr.bf16.mxu1 %v2162_v61  ;;  %v2194_v61 = vpack.c.bf16 %v818_v59, %v816_v58 }
 0x1a9   :  { %2193 = vmatpush1.bf16.msra.mxu0 %v2192_v60  ;;  %v844_v60 = vld [vmem:[%s3951_s28 + $0x1a8] sm:$0xff] }
 0x1aa   :  { %2195 = vmatprep.subr.bf16.mxu0 %v2194_v61  ;;  %v843_v61 = vld [vmem:[%s3951_s28 + $0x1a0] sm:$0xff] }
 0x1ab   :  { %2165 = vmatpush3.bf16.msra.mxu1 %v2164_v0  ;;  %v820_v0 = vld [vmem:[%s3951_s28 + $0xe8] sm:$0xff] }
 0x1ac   :  { %2167 = vmatprep.subr.bf16.mxu1 %v2166_v4  ;;  %v2198_v4 = vpack.c.bf16 %v822_v1, %v820_v0  ;;  %v2226_v0 = vpack.c.bf16 %v850_v63, %v848_v62  ;;  %v847_v1 = vld [vmem:[%s3951_s28 + $0x1c0] sm:$0xff]  ;;  %v876_v62 = vld [vmem:[%s3951_s28 + $0x2a8] sm:$0xff]  ;;  %v878_v63 = vld [vmem:[%s3951_s28 + $0x2b8] sm:$0xff] }
 0x1ad   :  { %2197 = vmatpush1.bf16.msra.mxu0 %v2196_v3  ;;  %v849_v3 = vld [vmem:[%s3951_s28 + $0x1d0] sm:$0xff] }
 0x1ae   :  { %2199 = vmatprep.subr.bf16.mxu0 %v2198_v4  ;;  %v2228_v4 = vpack.c.bf16 %v849_v3, %v847_v1  ;;  %v2254_v1 = vpack.c.bf16 %v878_v63, %v876_v62  ;;  %v875_v3 = vld [vmem:[%s3951_s28 + $0x2a0] sm:$0xff] }
 0x1af   :  { %2169 = vmatpush3.bf16.msra.mxu1 %v2168_v7  ;;  %v824_v7 = vld [vmem:[%s3951_s28 + $0x108] sm:$0xff] }
 0x265   :  { %v2958_v8 = vpop.f32.mrb[0].mxu1 }
 0x266   :  { %v2960_v9 = vpop.f32.mrb[1].mxu1 }
 0x267   :  { %v2503_v12 = vpack.i.bf16 %v2960_v9, %v2958_v8 }
 0x269   :  { %2504 = vrot.lane.b32.xlu0 %v2503_v12, %s2544_s2  ;;  %v2964_v13 = vpop.f32.mrb[2].mxu1  ;;  %v826_v12 = vld [vmem:[%s3951_s28 + $0x118] sm:$0xff] }
 0x26a   :  { %v2966_v14 = vpop.f32.mrb[3].mxu1 }
 0x26b   :  { %v2508_v16 = vpack.i.bf16 %v2966_v14, %v2964_v13 }
 0x26d   :  { %765 = vperm.xlu0 %2501, %v754_v15   ;;  %2509 = vrot.lane.b32.xlu1 %v2508_v16, %s2544_s2  ;;  %v2200_v15 = vpack.c.bf16 %v821_v6, %v819_v5  ;;  %v2202_v16 = vpack.c.bf16 %v826_v12, %v824_v7  ;;  %v852_v5 = vld [vmem:[%s3951_s28 + $0x1e8] sm:$0xff]  ;;  %v854_v6 = vld [vmem:[%s3951_s28 + $0x1f8] sm:$0xff]  ;;  %v851_v12 = vld [vmem:[%s3951_s28 + $0x1e0] sm:$0xff]  ;;  %s1891_s2 = sshll.u32 %s2548_s25, 4  ;;  %s1892_s2 = int_to_ptr.vmem [resolvable:$true] %s1891_s2 }
 0x26e   :  { %v2230_v7 = vpack.c.bf16 %v854_v6, %v852_v5  ;;  %v880_v5 = vld [vmem:[%s3951_s28 + $0x2c8] sm:$0xff]  ;;  %v882_v6 = vld [vmem:[%s3951_s28 + $0x2d8] sm:$0xff]  ;;  %p2523_p1 = scmp.lt.s32.totalorder %s1892_s2, %s1892_s2 }
 0x26f   :  { %2201 = vmatpush1.bf16.msra.mxu0 %v2200_v15  ;;  %v853_v15 = vld [vmem:[%s3951_s28 + $0x1f0] sm:$0xff] }
 0x270   :  { %2203 = vmatprep.subr.bf16.mxu0 %v2202_v16  ;;  %v2232_v16 = vpack.c.bf16 %v853_v15, %v851_v12  ;;  %v2258_v12 = vpack.c.bf16 %v882_v6, %v880_v5  ;;  %v879_v15 = vld [vmem:[%s3951_s28 + $0x2c0] sm:$0xff] }
 0x271   :  { %781 = vperm.xlu0 %2501, %v756_v17   ;;  %770 = vperm.xlu1 %2502, %v755_v18   ;;  %v823_v17 = vld [vmem:[%s3951_s28 + $0x100] sm:$0xff]  ;;  %v825_v18 = vld [vmem:[%s3951_s28 + $0x110] sm:$0xff] }
 0x272   :  { %v2204_v21 = vpack.c.bf16 %v825_v18, %v823_v17  ;;  %v856_v17 = vld [vmem:[%s3951_s28 + $0x208] sm:$0xff]  ;;  %v858_v18 = vld [vmem:[%s3951_s28 + $0x218] sm:$0xff] }
 0x274   :  { %2205 = vmatpush1.bf16.msra.mxu0 %v2204_v21 }
 0x275   :  { %786 = vperm.xlu1 %2502, %v757_v19   ;;  %v828_v19 = vld [vmem:[%s3951_s28 + $0x128] sm:$0xff] }
 0x279   :  { %1261 = vperm.xlu1 %2502, %v1255_v20   ;;  %v830_v20 = vld [vmem:[%s3951_s28 + $0x138] sm:$0xff] }
 0x27a   :  { %v2206_v22 = vpack.c.bf16 %v830_v20, %v828_v19  ;;  %v2234_v19 = vpack.c.bf16 %v858_v18, %v856_v17  ;;  %v884_v17 = vld [vmem:[%s3951_s28 + $0x2e8] sm:$0xff]  ;;  %v886_v18 = vld [vmem:[%s3951_s28 + $0x2f8] sm:$0xff] }
 0x27c   :  { %2207 = vmatprep.subr.bf16.mxu0 %v2206_v22 }
 0x27d   :  { %2209 = vmatpush1.bf16.msra.mxu0 %v2208_v29  ;;  %v857_v29 = vld [vmem:[%s3951_s28 + $0x210] sm:$0xff] }
 0x27e   :  { %2211 = vmatprep.subr.bf16.mxu0 %v2210_v30 }
 0x281   :  { %2213 = vmatpush1.bf16.msra.mxu0 %v2212_v35  ;;  %v862_v35 = vld [vmem:[%s3951_s28 + $0x238] sm:$0xff] }
 0x282   :  { %2215 = vmatprep.subr.bf16.mxu0 %v2214_v36  ;;  %v2236_v36 = vpack.c.bf16 %v857_v29, %v855_v28  ;;  %v2238_v43 = vpack.c.bf16 %v862_v35, %v860_v34 }
 0x285   :  { %2217 = vmatpush1.bf16.msra.mxu0 %v2216_v41 }
 0x286   :  { %2219 = vmatprep.subr.bf16.mxu0 %v2218_v42 }
 0x289   :  { %2221 = vmatpush1.bf16.msra.mxu0 %v2220_v45  ;;  %v861_v45 = vld [vmem:[%s3951_s28 + $0x230] sm:$0xff] }
 0x2db   :  { %v2505_v47 = vpop.permute.xlu0 %2504 }
 0x2dc   :  { %v2507_v48 = vunpack.i.h.bf16 %v2505_v47  ;;  %v2506_v49 = vunpack.i.l.bf16 %v2505_v47  ;;  %v864_v47 = vld [vmem:[%s3951_s28 + $0x248] sm:$0xff] }
 0x2de   :  { %v639_v50 = vsel %vm638_vm3, %v2506_v49, %v2507_v48  ;;  %v641_v51 = vsel %vm638_vm3, %v2507_v48, %v2506_v49  ;;  %v866_v48 = vld [vmem:[%s3951_s28 + $0x258] sm:$0xff] }
 0x2df   :  { %v643_v52 = vmax.f32 %v2958_v8, %v639_v50  ;;  %v2510_v53 = vpop.permute.xlu1 %2509  ;;  %v644_v54 = vmax.f32 %v2960_v9, %v641_v51  ;;  %v846_v8 = vld [vmem:[%s3951_s28 + $0x1b8] sm:$0xff]  ;;  %v2240_v50 = vpack.c.bf16 %v861_v45, %v859_v44 }
 0x2e0   :  { %v2512_v55 = vunpack.i.h.bf16 %v2510_v53  ;;  %v2511_v56 = vunpack.i.l.bf16 %v2510_v53  ;;  %v2222_v9 = vpack.c.bf16 %v846_v8, %v844_v60  ;;  %v863_v53 = vld [vmem:[%s3951_s28 + $0x240] sm:$0xff]  ;;  %v872_v60 = vld [vmem:[%s3951_s28 + $0x288] sm:$0xff]  ;;  %v874_v8 = vld [vmem:[%s3951_s28 + $0x298] sm:$0xff] }
 0x2e1   :  { %743 = vmatprep.mubr.f32.mxu1 %v644_v54  ;;  %v865_v54 = vld [vmem:[%s3951_s28 + $0x250] sm:$0xff] }
 0x2e2   :  { %744 = vmatmul.mubr.f32.vlgmr.msra.gmra.mrb[4].mxu1 %v643_v52  ;;  %v642_v57 = vsel %vm638_vm3, %v2512_v55, %v2511_v56  ;;  %v640_v58 = vsel %vm638_vm3, %v2511_v56, %v2512_v55  ;;  %2223 = vmatprep.subr.bf16.mxu0 %v2222_v9  ;;  %v2242_v52 = vpack.c.bf16 %v866_v48, %v864_v47  ;;  %v868_v55 = vld [vmem:[%s3951_s28 + $0x268] sm:$0xff]  ;;  %v870_v56 = vld [vmem:[%s3951_s28 + $0x278] sm:$0xff] }
 0x2e3   :  { %v646_v2 = vmax.f32 %v2966_v14, %v642_v57  ;;  %v645_v59 = vmax.f32 %v2964_v13, %v640_v58  ;;  %v845_v14 = vld [vmem:[%s3951_s28 + $0x1b0] sm:$0xff]  ;;  %v2244_v57 = vpack.c.bf16 %v865_v54, %v863_v53  ;;  %v2246_v58 = vpack.c.bf16 %v870_v56, %v868_v55 }
 0x2e4   :  { %v2224_v13 = vpack.c.bf16 %v845_v14, %v843_v61  ;;  %v2250_v61 = vpack.c.bf16 %v874_v8, %v872_v60  ;;  %v871_v14 = vld [vmem:[%s3951_s28 + $0x280] sm:$0xff] }
 0x2e5   :  { %748 = vmatprep.mubr.f32.mxu1 %v646_v2  ;;  %v867_v2 = vld [vmem:[%s3951_s28 + $0x260] sm:$0xff] }
 0x2e6   :  { %749 = vmatmul.mubr.f32.gmra.mrb[6].mxu1 %v645_v59  ;;  %2225 = vmatpush1.bf16.msra.mxu0 %v2224_v13  ;;  %v869_v59 = vld [vmem:[%s3951_s28 + $0x270] sm:$0xff]  ;;  %v1169_v60 = vld [vmem:[%s3917_s12 + $0x80] sm:$0xff] }
 0x2e7   :  { %2227 = vmatprep.subr.bf16.mxu0 %v2226_v0  ;;  %v2248_v9 = vpack.c.bf16 %v869_v59, %v867_v2  ;;  %v873_v13 = vld [vmem:[%s3951_s28 + $0x290] sm:$0xff]  ;;  %v1068_v59 = vld [vmem:[%s3916_s11] sm:$0xff] }
 0x2e8   :  { %v2252_v0 = vpack.c.bf16 %v873_v13, %v871_v14  ;;  %v1153_v8 = vld [vmem:[%s3917_s12] sm:$0xff]  ;;  %v1171_v14 = vld [vmem:[%s3917_s12 + $0x90] sm:$0xff]  ;;  %v1172_v13 = vld [vmem:[%s3917_s12 + $0x98] sm:$0xff] }
 0x2e9   :  { %v2274_v63 = vpack.c.bf16 %v1172_v13, %v1171_v14 }
 0x2ea   :  { %2229 = vmatpush1.bf16.msra.mxu0 %v2228_v4  ;;  %v877_v4 = vld [vmem:[%s3951_s28 + $0x2b0] sm:$0xff] }
 0x2eb   :  { %2231 = vmatprep.subr.bf16.mxu0 %v2230_v7  ;;  %v2256_v7 = vpack.c.bf16 %v877_v4, %v875_v3  ;;  %v1173_v3 = vld [vmem:[%s3917_s12 + $0xa0] sm:$0xff]  ;;  %v1174_v4 = vld [vmem:[%s3917_s12 + $0xa8] sm:$0xff] }
 0x2ec   :  { %v766_v37 = vpop.permute.xlu0 %765  ;;  %v2278_v6 = vpack.c.bf16 %v1174_v4, %v1173_v3 }
 0x2ee   :  { %2233 = vmatpush1.bf16.msra.mxu0 %v2232_v16  ;;  %v881_v16 = vld [vmem:[%s3951_s28 + $0x2d0] sm:$0xff] }
 0x2ef   :  { %2235 = vmatprep.subr.bf16.mxu0 %v2234_v19  ;;  %v2260_v19 = vpack.c.bf16 %v881_v16, %v879_v15  ;;  %v1175_v15 = vld [vmem:[%s3917_s12 + $0xb0] sm:$0xff]  ;;  %v1176_v16 = vld [vmem:[%s3917_s12 + $0xb8] sm:$0xff] }
 0x2f0   :  { %v771_v49 = vpop.permute.xlu1 %770 }
 0x2f4   :  { %v787_v28 = vpop.permute.xlu1 %786 }
 0x3b5   :  { %v1950_v20 = vpop.f32.mrb[4].mxu1 }
 0x3b6   :  { %v1951_v21 = vpop.f32.mrb[5].mxu1 }
 0x3b7   :  { %v1952_v22 = vadd.f32 %v1951_v21, %v1950_v20  ;;  %v2262_v20 = vpack.c.bf16 %v886_v18, %v884_v17  ;;  %v883_v21 = vld [vmem:[%s3951_s28 + $0x2e0] sm:$0xff]  ;;  %v2282_v18 = vpack.c.bf16 %v1176_v16, %v1175_v15 }
 0x3b9   :  { %v1953_v24 = vpop.f32.mrb[6].mxu1  ;;  %962 = vmatprep.mubr.f32.mxu0 %v1952_v22  ;;  %v759_v30 = vrot.slane %v1952_v22, 7  ;;  %v775_v31 = vrot.slane %v1952_v22, 1  ;;  %v885_v22 = vld [vmem:[%s3951_s28 + $0x2f0] sm:$0xff] }
 0x3ba   :  { %v1954_v26 = vpop.f32.mrb[7].mxu1 }
 0x3bb   :  { %v1955_v27 = vadd.f32 %v1954_v26, %v1953_v24  ;;  %v2264_v24 = vpack.c.bf16 %v885_v22, %v883_v21  ;;  %v782_v26 = vpop.permute.xlu0 %781  ;;  %v1177_v21 = vld [vmem:[%s3917_s12 + $0xc0] sm:$0xff]  ;;  %v1178_v22 = vld [vmem:[%s3917_s12 + $0xc8] sm:$0xff] }
 0x3bd   :  { %v760_v32 = vrot.slane %v1955_v27, 7  ;;  %v776_v33 = vrot.slane %v1955_v27, 1 }
 0x3bf   :  { %v762_v38 = vsel %vm94_vm1, %v760_v32, %v759_v30  ;;  %v3207_v39 = vsel %vm127_vm0, %v775_v31, %v776_v33  ;;  %v761_v40 = vsel %vm94_vm1, %v759_v30, %v760_v32  ;;  %v3213_v41 = vsel %vm127_vm0, %v776_v33, %v775_v31  ;;  %v758_v30 = vld [vmem:[%s3913_s8] sm:$0x3] }
 0x3c0   :  { %v773_v42 = vmul.f32 %v766_v37, %v762_v38  ;;  %v774_v51 = vmul.f32 %v771_v49, %v761_v40  ;;  %v790_v29 = vmul.f32 %v787_v28, %v3213_v41  ;;  %v891_v31 = vrot.slane %v758_v30, %v2827_v23  ;;  %v1162_v28 = vld [vmem:[%s3917_s12 + $0x48] sm:$0xff] }
 0x3c1   :  { %v895_v32 = vrot.slane %v758_v30, %v2833_v25  ;;  %v1180_v30 = vld [vmem:[%s3917_s12 + $0xd8] sm:$0xff] }
 0x3c2   :  { %963 = vmatmul.mubr.f32.vlgmr.msra.gmra.mrb[8].mxu0 %v773_v42 }
 0x3c3   :  { %2237 = vmatpush1.bf16.msra.mxu0 %v2236_v36  ;;  %968 = vmatprep.mubr.f32.mxu0 %v1955_v27  ;;  %v789_v27 = vmul.f32 %v782_v26, %v3207_v39  ;;  %v2286_v26 = vpack.c.bf16 %v1178_v22, %v1177_v21 }
 0x3c4   :  { %2239 = vmatprep.subr.bf16.mxu0 %v2238_v43 }
 0x3c6   :  { %969 = vmatmul.mubr.f32.gmra.mrb[10].mxu0 %v774_v51 }
 0x3c7   :  { %2241 = vmatpush1.bf16.msra.mxu0 %v2240_v50  ;;  %1039 = vmatprep.mubr.f32.mxu0 %v2543_v10 }
 0x3c8   :  { %2243 = vmatprep.subr.bf16.mxu0 %v2242_v52 }
 0x3cb   :  { %2245 = vmatpush1.bf16.msra.mxu0 %v2244_v57 }
 0x3cc   :  { %2247 = vmatprep.subr.bf16.mxu0 %v2246_v58 }
 0x3cf   :  { %2249 = vmatpush1.bf16.msra.mxu0 %v2248_v9  ;;  %v2270_v9 = vpack.c.bf16 %v1170_v11, %v1169_v60  ;;  %v1277_v60 = vld [vmem:[%s3918_s13 + $0x28] sm:$0xff]  ;;  %v1279_v11 = vld [vmem:[%s3918_s13 + $0x38] sm:$0xff] }
 0x3d0   :  { %2251 = vmatprep.subr.bf16.mxu0 %v2250_v61  ;;  %v1154_v61 = vld [vmem:[%s3917_s12 + $0x8] sm:$0xff]  ;;  %v2306_v13 = vpack.c.bf16 %v1279_v11, %v1277_v60  ;;  %v1312_v11 = vld [vmem:[%s3918_s13 + $0x140] sm:$0xff] }
 0x3d1   :  { %v2272_v62 = vpack.c.bf16 %v1154_v61, %v1153_v8  ;;  %2271 = vmatprep.subr.bf16.mxu1 %v2270_v9 }
 0x3d3   :  { %2253 = vmatpush1.bf16.msra.mxu0 %v2252_v0  ;;  %v1155_v0 = vld [vmem:[%s3917_s12 + $0x10] sm:$0xff]  ;;  %2273 = vmatpush3.bf16.msra.mxu1 %v2272_v62  ;;  %v1276_v62 = vld [vmem:[%s3918_s13 + $0x20] sm:$0xff] }
 0x3d4   :  { %2255 = vmatprep.subr.bf16.mxu0 %v2254_v1  ;;  %v1156_v1 = vld [vmem:[%s3917_s12 + $0x18] sm:$0xff]  ;;  %2275 = vmatprep.subr.bf16.mxu1 %v2274_v63  ;;  %v1278_v63 = vld [vmem:[%s3918_s13 + $0x30] sm:$0xff] }
 0x3d5   :  { %v2276_v5 = vpack.c.bf16 %v1156_v1, %v1155_v0  ;;  %v1281_v0 = vld [vmem:[%s3918_s13 + $0x48] sm:$0xff]  ;;  %v1283_v1 = vld [vmem:[%s3918_s13 + $0x58] sm:$0xff]  ;;  %v2308_v3 = vpack.c.bf16 %v1278_v63, %v1276_v62  ;;  %v1318_v62 = vld [vmem:[%s3918_s13 + $0x170] sm:$0xff] }
 0x3d6   :  { %v2310_v4 = vpack.c.bf16 %v1283_v1, %v1281_v0  ;;  %v1321_v63 = vld [vmem:[%s3918_s13 + $0x188] sm:$0xff]  ;;  %v1323_v0 = vld [vmem:[%s3918_s13 + $0x198] sm:$0xff] }
 0x3d7   :  { %2257 = vmatpush1.bf16.msra.mxu0 %v2256_v7  ;;  %v1157_v7 = vld [vmem:[%s3917_s12 + $0x20] sm:$0xff]  ;;  %2277 = vmatpush3.bf16.msra.mxu1 %v2276_v5 }
 0x3d8   :  { %2259 = vmatprep.subr.bf16.mxu0 %v2258_v12  ;;  %v1158_v12 = vld [vmem:[%s3917_s12 + $0x28] sm:$0xff]  ;;  %2279 = vmatprep.subr.bf16.mxu1 %v2278_v6  ;;  %v1280_v5 = vld [vmem:[%s3918_s13 + $0x40] sm:$0xff]  ;;  %v1282_v6 = vld [vmem:[%s3918_s13 + $0x50] sm:$0xff] }
 0x3d9   :  { %v2280_v17 = vpack.c.bf16 %v1158_v12, %v1157_v7  ;;  %v1285_v7 = vld [vmem:[%s3918_s13 + $0x68] sm:$0xff]  ;;  %v1287_v12 = vld [vmem:[%s3918_s13 + $0x78] sm:$0xff]  ;;  %v2312_v15 = vpack.c.bf16 %v1282_v6, %v1280_v5  ;;  %v1322_v5 = vld [vmem:[%s3918_s13 + $0x190] sm:$0xff] }
 0x3da   :  { %v2314_v16 = vpack.c.bf16 %v1287_v12, %v1285_v7  ;;  %v1325_v6 = vld [vmem:[%s3918_s13 + $0x1a8] sm:$0xff]  ;;  %v1327_v7 = vld [vmem:[%s3918_s13 + $0x1b8] sm:$0xff] }
 0x3db   :  { %2261 = vmatpush1.bf16.msra.mxu0 %v2260_v19  ;;  %v1159_v19 = vld [vmem:[%s3917_s12 + $0x30] sm:$0xff]  ;;  %2281 = vmatpush3.bf16.msra.mxu1 %v2280_v17  ;;  %v1284_v17 = vld [vmem:[%s3918_s13 + $0x60] sm:$0xff] }
 0x3dc   :  { %2263 = vmatprep.subr.bf16.mxu0 %v2262_v20  ;;  %v1160_v20 = vld [vmem:[%s3917_s12 + $0x38] sm:$0xff]  ;;  %2283 = vmatprep.subr.bf16.mxu1 %v2282_v18  ;;  %v1286_v18 = vld [vmem:[%s3918_s13 + $0x70] sm:$0xff] }
 0x3dd   :  { %v2316_v21 = vpack.c.bf16 %v1286_v18, %v1284_v17  ;;  %v1326_v17 = vld [vmem:[%s3918_s13 + $0x1b0] sm:$0xff]  ;;  %v1329_v18 = vld [vmem:[%s3918_s13 + $0x1c8] sm:$0xff] }
 0x3df   :  { %2265 = vmatpush1.bf16.msra.mxu0 %v2264_v24  ;;  %v2284_v24 = vpack.c.bf16 %v1160_v20, %v1159_v19  ;;  %v1289_v19 = vld [vmem:[%s3918_s13 + $0x88] sm:$0xff]  ;;  %v1291_v20 = vld [vmem:[%s3918_s13 + $0x98] sm:$0xff] }
 0x3e0   :  { %v2318_v22 = vpack.c.bf16 %v1291_v20, %v1289_v19  ;;  %v1331_v19 = vld [vmem:[%s3918_s13 + $0x1d8] sm:$0xff] }
 0x3e1   :  { %2285 = vmatpush3.bf16.msra.mxu1 %v2284_v24  ;;  %v1288_v24 = vld [vmem:[%s3918_s13 + $0x80] sm:$0xff] }
 0x3e2   :  { %1040 = vmatmul.mubr.f32.vlgmr.msra.gmra.mrb[8].mxu0 %v789_v27  ;;  %v1161_v27 = vld [vmem:[%s3917_s12 + $0x40] sm:$0xff]  ;;  %2287 = vmatprep.subr.bf16.mxu1 %v2286_v26  ;;  %v1290_v26 = vld [vmem:[%s3918_s13 + $0x90] sm:$0xff] }
 0x3e3   :  { %1045 = vmatprep.mubr.f32.mxu0 %v2543_v10 }
 0x3e6   :  { %1046 = vmatmul.mubr.f32.gmra.mrb[10].mxu0 %v790_v29  ;;  %v1179_v29 = vld [vmem:[%s3917_s12 + $0xd0] sm:$0xff] }
 0x3e7   :  { %1137 = vmatprep.mubr.f32.mxu0 %v2543_v10 }
 0x4b5   :  { %v1041_v33 = vpop.f32.mrb[8].mxu0 }
 0x4b6   :  { %v2466_v34 = vadd.f32 %v1041_v33, %v891_v31  ;;  %v1043_v35 = vpop.f32.mrb[9].mxu0  ;;  %v1163_v33 = vld [vmem:[%s3917_s12 + $0x50] sm:$0xff] }
 0x4b7   :  { %v2467_v36 = vadd.f32 %v1043_v35, %v895_v32  ;;  %v1181_v35 = vld [vmem:[%s3917_s12 + $0xe0] sm:$0xff] }
 0x4b8   :  { %v1052_v38 = vmax.f32 %v2466_v34, 0.0  ;;  %v1164_v34 = vld [vmem:[%s3917_s12 + $0x58] sm:$0xff] }
 0x4b9   :  { %v1047_v37 = vpop.f32.mrb[10].mxu0  ;;  %v1053_v41 = vmax.f32 %v2467_v36, 0.0  ;;  %v1182_v36 = vld [vmem:[%s3917_s12 + $0xe8] sm:$0xff] }
 0x4ba   :  { %v2468_v39 = vadd.f32 %v1047_v37, %v891_v31  ;;  %v1049_v40 = vpop.f32.mrb[11].mxu0  ;;  %v1056_v45 = vrot.slane %v1052_v38, 1  ;;  %v2288_v31 = vpack.c.bf16 %v1162_v28, %v1161_v27  ;;  %v2292_v37 = vpack.c.bf16 %v1164_v34, %v1163_v33  ;;  %v1293_v27 = vld [vmem:[%s3918_s13 + $0xa8] sm:$0xff]  ;;  %v1295_v28 = vld [vmem:[%s3918_s13 + $0xb8] sm:$0xff] }
 0x4bb   :  { %v2469_v42 = vadd.f32 %v1049_v40, %v895_v32  ;;  %v1057_v48 = vrot.slane %v1053_v41, 1  ;;  %v2290_v32 = vpack.c.bf16 %v1180_v30, %v1179_v29  ;;  %v1166_v40 = vld [vmem:[%s3917_s12 + $0x68] sm:$0xff]  ;;  %v2320_v29 = vpack.c.bf16 %v1290_v26, %v1288_v24  ;;  %v1299_v34 = vld [vmem:[%s3918_s13 + $0xd8] sm:$0xff]  ;;  %v1330_v24 = vld [vmem:[%s3918_s13 + $0x1d0] sm:$0xff] }
 0x4bc   :  { %v1054_v43 = vmax.f32 %v2468_v39, 0.0  ;;  %2289 = vmatpush3.bf16.msra.mxu1 %v2288_v31  ;;  %v1165_v39 = vld [vmem:[%s3917_s12 + $0x60] sm:$0xff]  ;;  %v2322_v30 = vpack.c.bf16 %v1295_v28, %v1293_v27  ;;  %v1297_v33 = vld [vmem:[%s3918_s13 + $0xc8] sm:$0xff]  ;;  %v1335_v28 = vld [vmem:[%s3918_s13 + $0x1f8] sm:$0xff] }
 0x4bd   :  { %v1055_v44 = vmax.f32 %v2469_v42, 0.0  ;;  %2291 = vmatprep.subr.bf16.mxu1 %v2290_v32  ;;  %v1183_v42 = vld [vmem:[%s3917_s12 + $0xf0] sm:$0xff]  ;;  %v1292_v31 = vld [vmem:[%s3918_s13 + $0xa0] sm:$0xff]  ;;  %v1333_v27 = vld [vmem:[%s3918_s13 + $0x1e8] sm:$0xff] }
 0x4be   :  { %v1058_v47 = vrot.slane %v1054_v43, 1  ;;  %v1294_v32 = vld [vmem:[%s3918_s13 + $0xb0] sm:$0xff] }
 0x4bf   :  { %v1059_v49 = vrot.slane %v1055_v44, 1 }
 0x4c0   :  { %v1060_v50 = vsel %vm127_vm0, %v1056_v45, %v1058_v47  ;;  %v1062_v51 = vsel %vm127_vm0, %v1058_v47, %v1056_v45  ;;  %2293 = vmatpush3.bf16.msra.mxu1 %v2292_v37  ;;  %v1167_v45 = vld [vmem:[%s3917_s12 + $0x70] sm:$0xff]  ;;  %v1168_v47 = vld [vmem:[%s3917_s12 + $0x78] sm:$0xff]  ;;  %v1296_v37 = vld [vmem:[%s3918_s13 + $0xc0] sm:$0xff] }
 0x4c1   :  { %v1064_v52 = vmax.f32 %v1052_v38, %v1060_v50  ;;  %v1066_v53 = vmax.f32 %v1054_v43, %v1062_v51  ;;  %v1063_v54 = vsel %vm127_vm0, %v1059_v49, %v1057_v48  ;;  %v1061_v55 = vsel %vm127_vm0, %v1057_v48, %v1059_v49  ;;  %v1184_v43 = vld [vmem:[%s3917_s12 + $0xf8] sm:$0xff] }
 0x4c2   :  { %v1067_v56 = vmax.f32 %v1055_v44, %v1063_v54  ;;  %v1065_v57 = vmax.f32 %v1053_v41, %v1061_v55  ;;  %v2294_v38 = vpack.c.bf16 %v1182_v36, %v1181_v35  ;;  %v2296_v41 = vpack.c.bf16 %v1166_v40, %v1165_v39  ;;  %v1275_v54 = vld [vmem:[%s3918_s13 + $0x18] sm:$0xff]  ;;  %v1301_v39 = vld [vmem:[%s3918_s13 + $0xe8] sm:$0xff] }
 0x4c3   :  { %v2268_v58 = vpack.c.bf16 %v1066_v53, %v1064_v52  ;;  %v2298_v44 = vpack.c.bf16 %v1184_v43, %v1183_v42  ;;  %v2300_v48 = vpack.c.bf16 %v1168_v47, %v1167_v45  ;;  %v1256_v52 = vld [vmem:[%s3921_s16] sm:$0xff]  ;;  %v1273_v53 = vld [vmem:[%s3918_s13 + $0x8] sm:$0xff]  ;;  %v2324_v35 = vpack.c.bf16 %v1294_v32, %v1292_v31  ;;  %v1303_v40 = vld [vmem:[%s3918_s13 + $0xf8] sm:$0xff] }
 0x4c4   :  { %v2266_v2 = vpack.c.bf16 %v1067_v56, %v1065_v57  ;;  %2295 = vmatprep.subr.bf16.mxu1 %v2294_v38  ;;  %v2302_v55 = vpack.c.bf16 %v1275_v54, %v1273_v53  ;;  %v2326_v36 = vpack.c.bf16 %v1299_v34, %v1297_v33  ;;  %v1298_v38 = vld [vmem:[%s3918_s13 + $0xd0] sm:$0xff]  ;;  %v2330_v42 = vpack.c.bf16 %v1303_v40, %v1301_v39  ;;  %v1300_v43 = vld [vmem:[%s3918_s13 + $0xe0] sm:$0xff]  ;;  %v1305_v45 = vld [vmem:[%s3918_s13 + $0x108] sm:$0xff] }
 0x4c5   :  { %2297 = vmatpush3.bf16.msra.mxu1 %v2296_v41  ;;  %v2328_v41 = vpack.c.bf16 %v1298_v38, %v1296_v37  ;;  %v1307_v47 = vld [vmem:[%s3918_s13 + $0x118] sm:$0xff]  ;;  %v1334_v31 = vld [vmem:[%s3918_s13 + $0x1f0] sm:$0xff]  ;;  %v1337_v33 = vld [vmem:[%s3918_s13 + $0x208] sm:$0xff] }
 0x4c6   :  { %2267 = vmatprep.subr.bf16.mxu0 %v2266_v2  ;;  %2299 = vmatprep.subr.bf16.mxu1 %v2298_v44  ;;  %v1272_v2 = vld [vmem:[%s3918_s13] sm:$0xff]  ;;  %v1302_v44 = vld [vmem:[%s3918_s13 + $0xf0] sm:$0xff]  ;;  %v1311_v53 = vld [vmem:[%s3918_s13 + $0x138] sm:$0xff] }
 0x4c7   :  { %2269 = vmatpush1.bf16.msra.mxu0 %v2268_v58  ;;  %v1339_v34 = vld [vmem:[%s3918_s13 + $0x218] sm:$0xff]  ;;  %v1336_v39 = vld [vmem:[%s3918_s13 + $0x200] sm:$0xff]  ;;  %v1338_v40 = vld [vmem:[%s3918_s13 + $0x210] sm:$0xff] }
 0x4c9   :  { %2301 = vmatpush3.bf16.msra.mxu1 %v2300_v48  ;;  %v2332_v48 = vpack.c.bf16 %v1302_v44, %v1300_v43  ;;  %v1262_v44 = vpop.permute.xlu1 %1261 }
 0x4ca   :  { %1913 = vmatmul.mubr.msk.f32.vlgmr.msra.gmra.mrb[12].mxu0 %vm1069_vm4, %v1068_v59  ;;  %2303 = vmatprep.subr.bf16.mxu1 %v2302_v55  ;;  %v1274_v59 = vld [vmem:[%s3918_s13 + $0x10] sm:$0xff] }
 0x4cb   :  { %1592 = vmatprep.mubr.f32.mxu0 %v2543_v10  ;;  %v2304_v14 = vpack.c.bf16 %v1274_v59, %v1272_v2  ;;  %v1315_v2 = vld [vmem:[%s3918_s13 + $0x158] sm:$0xff] }
 0x59d   :  { %v1139_v49 = vpop.f32.mrb[12].mxu0 }
 0x59e   :  { %v1141_v50 = vpop.f32.mrb[13].mxu0 }
 0x59f   :  { %v2513_v51 = vpack.i.bf16 %v1141_v50, %v1139_v49 }
 0x5a1   :  { %2514 = vrot.lane.b32.xlu0 %v2513_v51, %s2545_s3  ;;  %v1306_v51 = vld [vmem:[%s3918_s13 + $0x110] sm:$0xff] }
 0x5a5   :  { %1268 = vperm.xlu0 %2501, %v1256_v52   ;;  %v1309_v52 = vld [vmem:[%s3918_s13 + $0x128] sm:$0xff] }
 0x5a6   :  { %v2338_v55 = vpack.c.bf16 %v1311_v53, %v1309_v52  ;;  %v1347_v52 = vld [vmem:[%s3918_s13 + $0x258] sm:$0xff] }
 0x613   :  { %v2515_v56 = vpop.permute.xlu0 %2514 }
 0x614   :  { %v2517_v57 = vunpack.i.h.bf16 %v2515_v56  ;;  %v2516_v58 = vunpack.i.l.bf16 %v2515_v56  ;;  %v1308_v56 = vld [vmem:[%s3918_s13 + $0x120] sm:$0xff] }
 0x616   :  { %v1149_v46 = vsel %vm1148_vm5, %v2516_v58, %v2517_v57  ;;  %v1150_v8 = vsel %vm1148_vm5, %v2517_v57, %v2516_v58  ;;  %v1310_v57 = vld [vmem:[%s3918_s13 + $0x130] sm:$0xff]  ;;  %v1313_v58 = vld [vmem:[%s3918_s13 + $0x148] sm:$0xff] }
 0x617   :  { %v1151_v9 = vmax.f32 %v1139_v49, %v1149_v46  ;;  %v1152_v61 = vmax.f32 %v1141_v50, %v1150_v8  ;;  %v2334_v49 = vpack.c.bf16 %v1307_v47, %v1305_v45  ;;  %v1304_v50 = vld [vmem:[%s3918_s13 + $0x100] sm:$0xff]  ;;  %v2340_v59 = vpack.c.bf16 %v1310_v57, %v1308_v56  ;;  %v1314_v46 = vld [vmem:[%s3918_s13 + $0x150] sm:$0xff]  ;;  %v1317_v8 = vld [vmem:[%s3918_s13 + $0x168] sm:$0xff] }
 0x618   :  { %v2336_v54 = vpack.c.bf16 %v1306_v51, %v1304_v50  ;;  %v2342_v60 = vpack.c.bf16 %v1315_v2, %v1313_v58  ;;  %v2368_v45 = vpack.c.bf16 %v1338_v40, %v1336_v39  ;;  %v1342_v50 = vld [vmem:[%s3918_s13 + $0x230] sm:$0xff]  ;;  %v1345_v51 = vld [vmem:[%s3918_s13 + $0x248] sm:$0xff]  ;;  %v1351_v58 = vld [vmem:[%s3918_s13 + $0x278] sm:$0xff] }
 0x619   :  { %1249 = vmatprep.mubr.f32.mxu1 %v1152_v61  ;;  %v2344_v61 = vpack.c.bf16 %v1314_v46, %v1312_v11  ;;  %v1346_v56 = vld [vmem:[%s3918_s13 + $0x250] sm:$0xff]  ;;  %v1349_v57 = vld [vmem:[%s3918_s13 + $0x268] sm:$0xff]  ;;  %v1618_v39 = vld [vmem:[%s3923_s18 + $0x98] sm:$0xff] }
 0x61a   :  { %1250 = vmatmul.mubr.f32.vlgmr.msra.gmra.mrb[8].mxu1 %v1151_v9  ;;  %v1319_v9 = vld [vmem:[%s3918_s13 + $0x178] sm:$0xff]  ;;  %v1350_v11 = vld [vmem:[%s3918_s13 + $0x270] sm:$0xff]  ;;  %v1353_v46 = vld [vmem:[%s3918_s13 + $0x288] sm:$0xff] }
 0x61b   :  { %2305 = vmatpush1.bf16.msra.mxu1 %v2304_v14  ;;  %v2346_v14 = vpack.c.bf16 %v1319_v9, %v1317_v8  ;;  %v1355_v8 = vld [vmem:[%s3918_s13 + $0x298] sm:$0xff] }
 0x61c   :  { %2307 = vmatprep.subr.bf16.mxu1 %v2306_v13  ;;  %v1316_v13 = vld [vmem:[%s3918_s13 + $0x160] sm:$0xff] }
 0x61d   :  { %v2348_v1 = vpack.c.bf16 %v1318_v62, %v1316_v13  ;;  %v1354_v13 = vld [vmem:[%s3918_s13 + $0x290] sm:$0xff]  ;;  %v1357_v62 = vld [vmem:[%s3918_s13 + $0x2a8] sm:$0xff] }
 0x61f   :  { %2309 = vmatpush1.bf16.msra.mxu1 %v2308_v3  ;;  %v2350_v3 = vpack.c.bf16 %v1323_v0, %v1321_v63  ;;  %v1359_v63 = vld [vmem:[%s3918_s13 + $0x2b8] sm:$0xff] }
 0x620   :  { %2311 = vmatprep.subr.bf16.mxu1 %v2310_v4  ;;  %v1320_v4 = vld [vmem:[%s3918_s13 + $0x180] sm:$0xff] }
 0x621   :  { %v2352_v12 = vpack.c.bf16 %v1322_v5, %v1320_v4  ;;  %v1358_v4 = vld [vmem:[%s3918_s13 + $0x2b0] sm:$0xff]  ;;  %v1361_v5 = vld [vmem:[%s3918_s13 + $0x2c8] sm:$0xff] }
 0x623   :  { %2313 = vmatpush1.bf16.msra.mxu1 %v2312_v15  ;;  %v2354_v15 = vpack.c.bf16 %v1327_v7, %v1325_v6  ;;  %v1363_v6 = vld [vmem:[%s3918_s13 + $0x2d8] sm:$0xff] }
 0x624   :  { %2315 = vmatprep.subr.bf16.mxu1 %v2314_v16  ;;  %v1324_v16 = vld [vmem:[%s3918_s13 + $0x1a0] sm:$0xff] }
 0x625   :  { %v2356_v20 = vpack.c.bf16 %v1326_v17, %v1324_v16  ;;  %v1362_v16 = vld [vmem:[%s3918_s13 + $0x2d0] sm:$0xff]  ;;  %v1365_v17 = vld [vmem:[%s3918_s13 + $0x2e8] sm:$0xff] }
 0x627   :  { %2317 = vmatpush1.bf16.msra.mxu1 %v2316_v21  ;;  %v2358_v21 = vpack.c.bf16 %v1331_v19, %v1329_v18  ;;  %v1367_v18 = vld [vmem:[%s3918_s13 + $0x2f8] sm:$0xff] }
 0x628   :  { %2319 = vmatprep.subr.bf16.mxu1 %v2318_v22  ;;  %v1328_v22 = vld [vmem:[%s3918_s13 + $0x1c0] sm:$0xff] }
 0x629   :  { %v2360_v26 = vpack.c.bf16 %v1330_v24, %v1328_v22  ;;  %v1366_v22 = vld [vmem:[%s3918_s13 + $0x2f0] sm:$0xff] }
 0x62b   :  { %2321 = vmatpush1.bf16.msra.mxu1 %v2320_v29  ;;  %v2362_v29 = vpack.c.bf16 %v1335_v28, %v1333_v27  ;;  %v1269_v27 = vpop.permute.xlu0 %1268 }
 0x62c   :  { %2323 = vmatprep.subr.bf16.mxu1 %v2322_v30  ;;  %v1332_v30 = vld [vmem:[%s3918_s13 + $0x1e0] sm:$0xff] }
 0x62d   :  { %v2364_v32 = vpack.c.bf16 %v1334_v31, %v1332_v30 }
 0x62f   :  { %2325 = vmatpush1.bf16.msra.mxu1 %v2324_v35  ;;  %v2366_v35 = vpack.c.bf16 %v1339_v34, %v1337_v33 }
 0x630   :  { %2327 = vmatprep.subr.bf16.mxu1 %v2326_v36 }
 0x633   :  { %2329 = vmatpush1.bf16.msra.mxu1 %v2328_v41  ;;  %v1341_v41 = vld [vmem:[%s3918_s13 + $0x228] sm:$0xff] }
 0x634   :  { %2331 = vmatprep.subr.bf16.mxu1 %v2330_v42  ;;  %v1343_v42 = vld [vmem:[%s3918_s13 + $0x238] sm:$0xff] }
 0x637   :  { %2333 = vmatpush1.bf16.msra.mxu1 %v2332_v48  ;;  %v2370_v48 = vpack.c.bf16 %v1343_v42, %v1341_v41 }
 0x638   :  { %2335 = vmatprep.subr.bf16.mxu1 %v2334_v49  ;;  %v1340_v49 = vld [vmem:[%s3918_s13 + $0x220] sm:$0xff] }
 0x639   :  { %v2372_v53 = vpack.c.bf16 %v1342_v50, %v1340_v49  ;;  %v1619_v49 = vld [vmem:[%s3923_s18 + $0xa0] sm:$0xff]  ;;  %v1620_v50 = vld [vmem:[%s3923_s18 + $0xa8] sm:$0xff] }
 0x63b   :  { %2337 = vmatpush1.bf16.msra.mxu1 %v2336_v54  ;;  %v2374_v54 = vpack.c.bf16 %v1347_v52, %v1345_v51  ;;  %v2406_v52 = vpack.c.bf16 %v1620_v50, %v1619_v49  ;;  %v1799_v49 = vld [vmem:[%s3926_s21 + $0x40] sm:$0xff]  ;;  %v1800_v50 = vld [vmem:[%s3926_s21 + $0x48] sm:$0xff] }
 0x63c   :  { %2339 = vmatprep.subr.bf16.mxu1 %v2338_v55  ;;  %v1344_v55 = vld [vmem:[%s3918_s13 + $0x240] sm:$0xff] }
 0x63d   :  { %v2376_v2 = vpack.c.bf16 %v1346_v56, %v1344_v55  ;;  %v1621_v55 = vld [vmem:[%s3923_s18 + $0xb0] sm:$0xff]  ;;  %v1622_v56 = vld [vmem:[%s3923_s18 + $0xb8] sm:$0xff] }
 0x63f   :  { %2341 = vmatpush1.bf16.msra.mxu1 %v2340_v59  ;;  %v2378_v59 = vpack.c.bf16 %v1351_v58, %v1349_v57  ;;  %v2410_v58 = vpack.c.bf16 %v1622_v56, %v1621_v55  ;;  %v1803_v55 = vld [vmem:[%s3926_s21 + $0x60] sm:$0xff]  ;;  %v1804_v56 = vld [vmem:[%s3926_s21 + $0x68] sm:$0xff] }
 0x640   :  { %2343 = vmatprep.subr.bf16.mxu1 %v2342_v60  ;;  %v1348_v60 = vld [vmem:[%s3918_s13 + $0x260] sm:$0xff] }
 0x641   :  { %v2380_v9 = vpack.c.bf16 %v1350_v11, %v1348_v60  ;;  %v1623_v60 = vld [vmem:[%s3923_s18 + $0xc0] sm:$0xff]  ;;  %v1624_v11 = vld [vmem:[%s3923_s18 + $0xc8] sm:$0xff] }
 0x643   :  { %2345 = vmatpush1.bf16.msra.mxu1 %v2344_v61  ;;  %v2382_v61 = vpack.c.bf16 %v1355_v8, %v1353_v46  ;;  %v2414_v8 = vpack.c.bf16 %v1624_v11, %v1623_v60  ;;  %v1805_v60 = vld [vmem:[%s3926_s21 + $0x70] sm:$0xff]  ;;  %v1806_v11 = vld [vmem:[%s3926_s21 + $0x78] sm:$0xff] }
 0x644   :  { %2347 = vmatprep.subr.bf16.mxu1 %v2346_v14  ;;  %v1352_v14 = vld [vmem:[%s3918_s13 + $0x280] sm:$0xff] }
 0x645   :  { %v2384_v0 = vpack.c.bf16 %v1354_v13, %v1352_v14  ;;  %v1625_v14 = vld [vmem:[%s3923_s18 + $0xd0] sm:$0xff]  ;;  %v1626_v13 = vld [vmem:[%s3923_s18 + $0xd8] sm:$0xff] }
 0x647   :  { %2349 = vmatpush1.bf16.msra.mxu1 %v2348_v1  ;;  %v2386_v1 = vpack.c.bf16 %v1359_v63, %v1357_v62  ;;  %v2418_v63 = vpack.c.bf16 %v1626_v13, %v1625_v14 }
 0x648   :  { %2351 = vmatprep.subr.bf16.mxu1 %v2350_v3  ;;  %v1356_v3 = vld [vmem:[%s3918_s13 + $0x2a0] sm:$0xff] }
 0x649   :  { %v2388_v7 = vpack.c.bf16 %v1358_v4, %v1356_v3  ;;  %v1627_v3 = vld [vmem:[%s3923_s18 + $0xe0] sm:$0xff]  ;;  %v1628_v4 = vld [vmem:[%s3923_s18 + $0xe8] sm:$0xff] }
 0x64b   :  { %2353 = vmatpush1.bf16.msra.mxu1 %v2352_v12  ;;  %v2390_v12 = vpack.c.bf16 %v1363_v6, %v1361_v5  ;;  %v2422_v6 = vpack.c.bf16 %v1628_v4, %v1627_v3 }
 0x64c   :  { %2355 = vmatprep.subr.bf16.mxu1 %v2354_v15  ;;  %v1360_v15 = vld [vmem:[%s3918_s13 + $0x2c0] sm:$0xff] }
 0x64d   :  { %v2392_v19 = vpack.c.bf16 %v1362_v16, %v1360_v15  ;;  %v1629_v15 = vld [vmem:[%s3923_s18 + $0xf0] sm:$0xff]  ;;  %v1630_v16 = vld [vmem:[%s3923_s18 + $0xf8] sm:$0xff] }
 0x64f   :  { %2357 = vmatpush1.bf16.msra.mxu1 %v2356_v20  ;;  %v2394_v20 = vpack.c.bf16 %v1367_v18, %v1365_v17  ;;  %v2426_v18 = vpack.c.bf16 %v1630_v16, %v1629_v15 }
 0x650   :  { %2359 = vmatprep.subr.bf16.mxu1 %v2358_v21  ;;  %v1364_v21 = vld [vmem:[%s3918_s13 + $0x2e0] sm:$0xff] }
 0x651   :  { %v2396_v24 = vpack.c.bf16 %v1366_v22, %v1364_v21  ;;  %v2546_v22 = vmov 0.0|0.0  }
 0x653   :  { %2361 = vmatpush1.bf16.msra.mxu1 %v2360_v26 }
 0x654   :  { %2363 = vmatprep.subr.bf16.mxu1 %v2362_v29  ;;  %v1257_v29 = vld [vmem:[%s3919_s14] sm:$0x3] }
 0x655   :  { %v1372_v30 = vrot.slane %v1257_v29, %v2827_v23  ;;  %v1376_v31 = vrot.slane %v1257_v29, %v2833_v25  ;;  %v1600_v23 = vld [vmem:[%s3923_s18 + $0x8] sm:$0xff]  ;;  %v1617_v25 = vld [vmem:[%s3923_s18 + $0x90] sm:$0xff] }
 0x657   :  { %2365 = vmatpush1.bf16.msra.mxu1 %v2364_v32 }
 0x658   :  { %2367 = vmatprep.subr.bf16.mxu1 %v2366_v35  ;;  %v1615_v35 = vld [vmem:[%s3923_s18 + $0x80] sm:$0xff] }
 0x6ed   :  { %v1988_v36 = vpop.f32.mrb[8].mxu1 }
 0x6ee   :  { %v1989_v37 = vpop.f32.mrb[9].mxu1 }
 0x6ef   :  { %v3613_v38 = vadd.f32 %v1989_v37, %v1988_v36  ;;  %v1616_v36 = vld [vmem:[%s3923_s18 + $0x88] sm:$0xff] }
 0x6f0   :  { %v2398_v41 = vpack.c.bf16 %v1616_v36, %v1615_v35  ;;  %v1707_v36 = vld [vmem:[%s3924_s19 + $0x30] sm:$0xff] }
 0x6f1   :  { %v1258_v43 = vrot.slane %v3613_v38, 7  ;;  %1443 = vmatprep.mubr.f32.mxu1 %v3613_v38  ;;  %v1265_v26 = vrot.slane %v3613_v38, 1  ;;  %v1599_v38 = vld [vmem:[%s3923_s18] sm:$0xff] }
 0x6f3   :  { %v1264_v47 = vmul.f32 %v1262_v44, %v1258_v43  ;;  %v1271_v28 = vmul.f32 %v1269_v27, %v1265_v26  ;;  %v1523_v43 = vld [vmem:[%s3922_s17] sm:$0x3]  ;;  %v2400_v44 = vpack.c.bf16 %v1600_v23, %v1599_v38  ;;  %v1702_v26 = vld [vmem:[%s3924_s19 + $0x8] sm:$0xff] }
 0x6f4   :  { %v1791_v23 = vld [vmem:[%s3926_s21] sm:$0xff] }
 0x6f5   :  { %1444 = vmatmul.mubr.f32.vlgmr.msra.gmra.mrb[10].mxu1 %v1264_v47  ;;  %v1601_v47 = vld [vmem:[%s3923_s18 + $0x10] sm:$0xff] }
 0x6f6   :  { %2369 = vmatpush1.bf16.msra.mxu1 %v2368_v45  ;;  %1514 = vmatprep.mubr.f32.mxu1 %v2543_v10  ;;  %v2402_v45 = vpack.c.bf16 %v1618_v39, %v1617_v25  ;;  %v1792_v25 = vld [vmem:[%s3926_s21 + $0x8] sm:$0xff]  ;;  %v1793_v39 = vld [vmem:[%s3926_s21 + $0x10] sm:$0xff] }
 0x6f7   :  { %2371 = vmatprep.subr.bf16.mxu1 %v2370_v48  ;;  %v1602_v48 = vld [vmem:[%s3923_s18 + $0x18] sm:$0xff] }
 0x6f8   :  { %v2404_v51 = vpack.c.bf16 %v1602_v48, %v1601_v47  ;;  %v1798_v47 = vld [vmem:[%s3926_s21 + $0x38] sm:$0xff] }
 0x6fa   :  { %2373 = vmatpush1.bf16.msra.mxu1 %v2372_v53  ;;  %v1603_v53 = vld [vmem:[%s3923_s18 + $0x20] sm:$0xff] }
 0x6fb   :  { %2375 = vmatprep.subr.bf16.mxu1 %v2374_v54  ;;  %v1604_v54 = vld [vmem:[%s3923_s18 + $0x28] sm:$0xff] }
 0x6fc   :  { %v2408_v57 = vpack.c.bf16 %v1604_v54, %v1603_v53  ;;  %v1802_v53 = vld [vmem:[%s3926_s21 + $0x58] sm:$0xff] }
 0x6fe   :  { %2377 = vmatpush1.bf16.msra.mxu1 %v2376_v2  ;;  %v1605_v2 = vld [vmem:[%s3923_s18 + $0x30] sm:$0xff] }
 0x6ff   :  { %2379 = vmatprep.subr.bf16.mxu1 %v2378_v59  ;;  %v1606_v59 = vld [vmem:[%s3923_s18 + $0x38] sm:$0xff] }
 0x700   :  { %v2412_v46 = vpack.c.bf16 %v1606_v59, %v1605_v2 }
 0x702   :  { %2381 = vmatpush1.bf16.msra.mxu1 %v2380_v9  ;;  %v1607_v9 = vld [vmem:[%s3923_s18 + $0x40] sm:$0xff] }
 0x703   :  { %2383 = vmatprep.subr.bf16.mxu1 %v2382_v61  ;;  %v1608_v61 = vld [vmem:[%s3923_s18 + $0x48] sm:$0xff] }
 0x704   :  { %v2416_v62 = vpack.c.bf16 %v1608_v61, %v1607_v9 }
 0x706   :  { %2385 = vmatpush1.bf16.msra.mxu1 %v2384_v0  ;;  %v1609_v0 = vld [vmem:[%s3923_s18 + $0x50] sm:$0xff] }
 0x707   :  { %2387 = vmatprep.subr.bf16.mxu1 %v2386_v1  ;;  %v1610_v1 = vld [vmem:[%s3923_s18 + $0x58] sm:$0xff] }
 0x708   :  { %v2420_v5 = vpack.c.bf16 %v1610_v1, %v1609_v0 }
 0x70a   :  { %2389 = vmatpush1.bf16.msra.mxu1 %v2388_v7  ;;  %v1611_v7 = vld [vmem:[%s3923_s18 + $0x60] sm:$0xff] }
 0x70b   :  { %2391 = vmatprep.subr.bf16.mxu1 %v2390_v12  ;;  %v1612_v12 = vld [vmem:[%s3923_s18 + $0x68] sm:$0xff] }
 0x70c   :  { %v2424_v17 = vpack.c.bf16 %v1612_v12, %v1611_v7 }
 0x70e   :  { %2393 = vmatpush1.bf16.msra.mxu1 %v2392_v19  ;;  %v1613_v19 = vld [vmem:[%s3923_s18 + $0x70] sm:$0xff] }
 0x70f   :  { %2395 = vmatprep.subr.bf16.mxu1 %v2394_v20  ;;  %v1614_v20 = vld [vmem:[%s3923_s18 + $0x78] sm:$0xff] }
 0x710   :  { %v2428_v21 = vpack.c.bf16 %v1614_v20, %v1613_v19 }
 0x712   :  { %2397 = vmatpush1.bf16.msra.mxu1 %v2396_v24  ;;  %v1701_v24 = vld [vmem:[%s3924_s19] sm:$0xff] }
 0x713   :  { %2442 = vmatprep.subr.bf16.mxu1 %v2546_v22 }
 0x715   :  { %1515 = vmatmul.mubr.f32.vlgmr.msra.gmra.mrb[10].mxu1 %v1271_v28  ;;  %v2431_v28 = vpack.c.bf16 %v1702_v26, %v1701_v24 }
 0x716   :  { %2103 = vmatprep.mubr.msk.f32.mxu1 %vm2547_vm7, %v2543_v10 }
 0x7e8   :  { %v1516_v32 = vpop.f32.mrb[10].mxu1 }
 0x7e9   :  { %v2470_v33 = vadd.f32 %v1516_v32, %v1372_v30  ;;  %v1518_v34 = vpop.f32.mrb[11].mxu1  ;;  %v1703_v30 = vld [vmem:[%s3924_s19 + $0x10] sm:$0xff] }
 0x7ea   :  { %v2471_v37 = vadd.f32 %v1518_v34, %v1376_v31  ;;  %v1704_v31 = vld [vmem:[%s3924_s19 + $0x18] sm:$0xff]  ;;  %v1706_v34 = vld [vmem:[%s3924_s19 + $0x28] sm:$0xff] }
 0x7eb   :  { %v1521_v42 = vmax.f32 %v2470_v33, 0.0  ;;  %v2434_v32 = vpack.c.bf16 %v1704_v31, %v1703_v30  ;;  %v1705_v33 = vld [vmem:[%s3924_s19 + $0x20] sm:$0xff] }
 0x7ec   :  { %v1522_v40 = vmax.f32 %v2471_v37, 0.0  ;;  %v2437_v35 = vpack.c.bf16 %v1706_v34, %v1705_v33  ;;  %v1708_v37 = vld [vmem:[%s3924_s19 + $0x38] sm:$0xff] }
 0x7ed   :  { %v2440_v38 = vpack.c.bf16 %v1708_v37, %v1707_v36 }
 0x7ee   :  { %1528 = vmatprep.subr.mxu0 %v1522_v40  ;;  %v2443_v40 = vpack.c.bf16 %v1792_v25, %v1791_v23 }
 0x7ef   :  { %1529 = vmatpush1.msra.mxu0 %v1521_v42 }
 0x7f0   :  { %1914 = vmatmul.mubr.msk.f32.vlgmr.msra.gmra.mrb[14].mxu0 %vm1524_vm6, %v1523_v43  ;;  %2399 = vmatprep.subr.bf16.mxu0 %v2398_v41  ;;  %v1794_v41 = vld [vmem:[%s3926_s21 + $0x18] sm:$0xff]  ;;  %v1796_v43 = vld [vmem:[%s3926_s21 + $0x28] sm:$0xff] }
 0x7f1   :  { %2401 = vmatpush3.bf16.msra.mxu0 %v2400_v44  ;;  %2444 = vmatpush3.bf16.msra.mxu1 %v2443_v40  ;;  %v2446_v42 = vpack.c.bf16 %v1794_v41, %v1793_v39 }
 0x7f2   :  { %2403 = vmatprep.subr.bf16.mxu0 %v2402_v45  ;;  %2445 = vmatprep.subr.bf16.mxu1 %v2546_v22  ;;  %v1797_v45 = vld [vmem:[%s3926_s21 + $0x30] sm:$0xff] }
 0x7f3   :  { %v2452_v48 = vpack.c.bf16 %v1798_v47, %v1797_v45 }
 0x7f5   :  { %2405 = vmatpush3.bf16.msra.mxu0 %v2404_v51  ;;  %2447 = vmatpush3.bf16.msra.mxu1 %v2446_v42  ;;  %v2455_v51 = vpack.c.bf16 %v1800_v50, %v1799_v49 }
 0x7f6   :  { %2407 = vmatprep.subr.bf16.mxu0 %v2406_v52  ;;  %2448 = vmatprep.subr.bf16.mxu1 %v2546_v22  ;;  %v1801_v52 = vld [vmem:[%s3926_s21 + $0x50] sm:$0xff] }
 0x7f7   :  { %v2458_v54 = vpack.c.bf16 %v1802_v53, %v1801_v52 }
 0x7f9   :  { %2409 = vmatpush3.bf16.msra.mxu0 %v2408_v57  ;;  %v2461_v57 = vpack.c.bf16 %v1804_v56, %v1803_v55 }
 0x7fa   :  { %2411 = vmatprep.subr.bf16.mxu0 %v2410_v58 }
 0x7fd   :  { %2413 = vmatpush3.bf16.msra.mxu0 %v2412_v46  ;;  %v2464_v46 = vpack.c.bf16 %v1806_v11, %v1805_v60 }
 0x7fe   :  { %2415 = vmatprep.subr.bf16.mxu0 %v2414_v8  ;;  %v1915_v8 = vld [vmem:[%s3925_s20] ss:$0 sm:$0xff] }
 0x801   :  { %2417 = vmatpush3.bf16.msra.mxu0 %v2416_v62  ;;  %v1917_v62 = vld [vmem:[%s3927_s22] ss:$0 sm:$0xff] }
 0x802   :  { %2419 = vmatprep.subr.bf16.mxu0 %v2418_v63 }
 0x805   :  { %2421 = vmatpush3.bf16.msra.mxu0 %v2420_v5 }
 0x806   :  { %2423 = vmatprep.subr.bf16.mxu0 %v2422_v6 }
 0x809   :  { %2425 = vmatpush3.bf16.msra.mxu0 %v2424_v17 }
 0x80a   :  { %2427 = vmatprep.subr.bf16.mxu0 %v2426_v18 }
 0x80d   :  { %2429 = vmatpush3.bf16.msra.mxu0 %v2428_v21 }
 0x80e   :  { %2430 = vmatprep.subr.bf16.mxu0 %v2546_v22 }
 0x8c3   :  { %v1594_v27 = vpop.f32.mrb[14].mxu0 }
 0x8c4   :  { %v1596_v29 = vpop.f32.mrb[15].mxu0 }
 0x8c5   :  { %1695 = vmatprep.mubr.f32.mxu0 %v1596_v29 }
 0x8c6   :  { %1696 = vmatmul.mubr.f32.vlgmr.msra.gmra.mrb[16].mxu0 %v1594_v27 }
 0x8c7   :  { %2432 = vmatpush3.bf16.msra.mxu0 %v2431_v28  ;;  %2068 = vmatprep.mubr.msk.f32.mxu0 %vm2547_vm7, %v2543_v10  ;;  %v1795_v10 = vld [vmem:[%s3926_s21 + $0x20] sm:$0xff]  ;;  %s2518_s21 = scalar_lea.vmem %s1892_s2, 32 }
 0x8c8   :  { %2433 = vmatprep.subr.bf16.mxu0 %v2546_v22  ;;  %v2449_v44 = vpack.c.bf16 %v1796_v43, %v1795_v10  ;;  %p2519_p0 = scmp.ne.s32.totalorder %s1892_s2, %s2518_s21  ;;  %p2524_p2 = scmp.lt.s32.totalorder %s2518_s21, %s2518_s21 }
 0x8ca   :  { %2450 = vmatpush3.bf16.msra.mxu1 %v2449_v44  ;;  %p2525_p3 = por %p2524_p2, %p2523_p1 }
 0x8cb   :  { %2435 = vmatpush3.bf16.msra.mxu0 %v2434_v32  ;;  %2451 = vmatprep.subr.bf16.mxu1 %v2546_v22 }
 0x8cc   :  { %2436 = vmatprep.subr.bf16.mxu0 %v2546_v22  ;;  %p2526_p4 = pnand %p2525_p3, %p2519_p0 }
 0x8ce   :  { %2453 = vmatpush3.bf16.msra.mxu1 %v2452_v48 }
 0x8cf   :  { %2438 = vmatpush3.bf16.msra.mxu0 %v2437_v35  ;;  %2454 = vmatprep.subr.bf16.mxu1 %v2546_v22 }
 0x8d0   :  { %2439 = vmatprep.subr.bf16.mxu0 %v2546_v22 }
 0x8d2   :  { %2456 = vmatpush3.bf16.msra.mxu1 %v2455_v51 }
 0x8d3   :  { %2441 = vmatpush3.bf16.msra.mxu0 %v2440_v38  ;;  %2457 = vmatprep.subr.bf16.mxu1 %v2546_v22 }
 0x8d6   :  { %2459 = vmatpush3.bf16.msra.mxu1 %v2458_v54 }
 0x8d7   :  { %2460 = vmatprep.subr.bf16.mxu1 %v2546_v22 }
 0x8da   :  { %2462 = vmatpush3.bf16.msra.mxu1 %v2461_v57 }
 0x8db   :  { %2463 = vmatprep.subr.bf16.mxu1 %v2546_v22 }
 0x8de   :  { %2465 = vmatpush3.bf16.msra.mxu1 %v2464_v46 }
 0x999   :  { %v2023_v58 = vpop.f32.mrb[16].mxu0 }
 0x99a   :  { %v2024_v2 = vpop.f32.mrb[17].mxu0 }
 0x99b   :  { %v2025_v59 = vadd.f32 %v2024_v2, %v2023_v58 }
 0x99d   :  { %2069 = vmatmul.mubr.msk.f32.vlgmr.msra.gmra.mrb[18].mxu0 %vm1716_vm8, %v2025_v59 }
 0xa70   :  { %v1786_v9 = vpop.f32.mrb[18].mxu0 }
 0xa71   :  { %v1787_v61 = vadd.f32 %v1915_v8, %v1786_v9  ;;  %v2070_v14 = vpop.f32.mrb[19].mxu0 }
 0xa73   :  { %v1790_v13 = vmax.f32 %v1787_v61, 0.0 }
 0xa75   :  { %2104 = vmatmul.mubr.f32.vlgmr.msra.gmra.mrb[12].mxu1 %v1790_v13 }
 0xb48   :  { %v1880_v63 = vpop.f32.mrb[12].mxu1 }
 0xb49   :  { %v1881_v0 = vadd.f32 %v1917_v62, %v1880_v63  ;;  %v2105_v1 = vpop.f32.mrb[13].mxu1 }
 0xb4b   :  { %1884 = vst [vmem:[#allocation2] sm:$0x3] %v1881_v0 }
 0xb4c   :  { %2529 = shalt.err (!%p2526_p4)
}
 0xb4d   :  { %s2530_s6 = scalar_lea.hbm %s3928_s23, 32 }
 0xb4e   :  { %p2531_p5 = scmp.ne.s32.totalorder %s3928_s23, %s2530_s6  ;;  %p2534_p6 = scmp.lt.u32.totalorder %s2530_s6, %s3928_s23 }
 0xb50   :  { %p2536_p7 = pnand %p2534_p6, %p2531_p5 }
 0xb52   :  { %2539 = shalt.err (!%p2536_p7)
}
 0xb53   :  { %1894 = dma.vmem_to_hbm [thread:$0]  %s1892_s2, 32, %s3928_s23, [#allocation3]  }
 0xb54   :  { %2540 = dma.done.wait [#allocation3], 32  }
 0xb55   :  { %2541 = vsyncadd [#allocation3], 4294967264 }
 0xb56   :  { %1898 = vsyncpa [#allocation3], 1 }

</bundles_post_ra>
